<compile_context>
chip_gen: v7x
topology: tpu7x:2x2x1
jax: 0.10.0
libtpu: 0.0.40
codegen_flags: <defaults>
</compile_context>

<pallas_src>
import jax
import jax.numpy as jnp
from jax.experimental import pallas as pl
from jax.experimental.pallas import tpu as pltpu  # noqa: F401  (TPU backend assumed)


def _caption_kernel(
    a_ref, yemb_ref, gamma_ref, beta_ref,
    w_h0_ref, b_h0_ref, w_proj_ref, b_proj_ref,
    w_atth_ref, b_atth_ref, w_attw_ref, b_attw_ref,
    w_gates_ref, b_lstm_ref, w_lh_ref, b_lh_ref, w_lo_ref, b_lo_ref,
    pred_ref, alpha_ref,
):
    a = a_ref[...]                                   # (B, C, L)
    B, C, L = a.shape
    T = yemb_ref.shape[0]
    H = w_atth_ref.shape[0]

    # Hoist all (loop-invariant) parameter reads out of the unrolled recurrence.
    gamma = gamma_ref[...]
    beta = beta_ref[...]
    w_h0 = w_h0_ref[...]
    b_h0 = b_h0_ref[...]
    w_proj = w_proj_ref[...]
    b_proj = b_proj_ref[...]
    w_atth = w_atth_ref[...]
    b_atth = b_atth_ref[...]
    w_attw = w_attw_ref[...]                         # (1, C)
    b_attw = b_attw_ref[...]                         # (1, 1)
    w_gates = w_gates_ref[...]                       # (E+C+H, 4H)
    b_lstm = b_lstm_ref[...]                         # (1, 4H)
    w_lh = w_lh_ref[...]
    b_lh = b_lh_ref[...]
    w_lo = w_lo_ref[...]                             # (E, Vp)  Vp = multiple of 128
    b_lo = b_lo_ref[...]                             # (1, Vp)

    # ---------------- one-shot preprocessing (runs exactly once; single grid point) ----
    amean_k = jnp.mean(a, axis=2, keepdims=True)     # (B, C, 1)  -- reused for BN mean
    amean = amean_k[:, :, 0]                         # (B, C)
    # h0 = c0 = tanh(init_h0_fc(mean(a, dim=2)))  (forward uses init_h0 for BOTH)
    h0 = jnp.tanh(
        jnp.dot(amean, w_h0, preferred_element_type=jnp.float32) + b_h0
    )                                                # (B, H)

    # BatchNorm1d: training-mode batch statistics (biased variance), eps = 1e-5.
    mu = jnp.mean(amean_k, axis=0, keepdims=True)                                   # (1, C, 1)
    m2 = jnp.mean(jnp.mean(a * a, axis=2, keepdims=True), axis=0, keepdims=True)    # (1, C, 1)
    var = m2 - mu * mu
    inv = jax.lax.rsqrt(var + 1e-5)
    a_bn = (a - mu) * inv * gamma[:, :, None] + beta[:, :, None]                    # (B, C, L)

    # a_proj = project_fc(a_bn.permute(0, 2, 1)): ONE (B*L, C)@(C, C) matmul.
    a_bn_t = jnp.stack([a_bn[b].T for b in range(B)], axis=0)                       # (B, L, C)
    a_proj = (
        jnp.dot(a_bn_t.reshape(B * L, C), w_proj,
                preferred_element_type=jnp.float32).reshape(B, L, C)
        + b_proj
    )                                                                               # (B, L, C)

    # ---------------- recurrence: fully unrolled, h/c live in vregs ----------------
    h = h0
    c = h0
    preds = []
    alphas = []
    for t in range(T):                               # T is small & static -> full unroll
        emb = yemb_ref[t]                            # (B, E) current-step embeddings

        # -------- attention --------
        h_att_lin = jnp.dot(h, w_atth, preferred_element_type=jnp.float32) + b_atth  # (B, C)
        h_att = jnp.maximum(h_att_lin[:, None, :] + a_proj, 0.0)                     # (B, L, C)
        # TODO(synk): at realistic C/L these two contractions should move to MXU
        # einsums (per perf review); at C=8 / L=16 the VPU+XLU forms are marginal.
        out_att = jnp.sum(h_att * w_attw[None, :, :], axis=-1) + b_attw              # (B, L)
        m = jnp.max(out_att, axis=-1, keepdims=True)
        e = jnp.exp(out_att - m)
        alpha = e * pl.reciprocal(jnp.sum(e, axis=-1, keepdims=True), approx=True)   # (B, L)
        z = jnp.sum(a_bn * alpha[:, None, :], axis=2)                                # (B, C)

        # -------- LSTM cell: single fused gate matmul (PyTorch gate order i,f,g,o) ----
        x = jnp.concatenate([emb, z, h], axis=1)                                     # (B, E+C+H)
        gates = jnp.dot(x, w_gates, preferred_element_type=jnp.float32) + b_lstm     # (B, 4H)
        sig = jax.nn.sigmoid(gates)                  # one full-vreg EUP pass
        tnh = jnp.tanh(gates)                        # one full-vreg EUP pass
        i_g = sig[:, 0:H]
        f_g = sig[:, H:2 * H]
        g_g = tnh[:, 2 * H:3 * H]
        o_g = sig[:, 3 * H:4 * H]
        c = f_g * c + i_g * g_g
        h = o_g * jnp.tanh(c)

        # -------- prediction head --------
        # TODO(synk): nn.Dropout has no deterministic equivalent; treated as identity.
        h_logits = jnp.tanh(
            jnp.dot(h, w_lh, preferred_element_type=jnp.float32) + b_lh
        )                                                                            # (B, E)
        p = jnp.dot(h_logits, w_lo, preferred_element_type=jnp.float32) + b_lo       # (B, Vp)
        preds.append(p)
        alphas.append(alpha)

    # Single slab store per output (pred rows are lane-dense: Vp is a multiple of 128).
    pred_ref[...] = jnp.stack(preds, axis=0)         # (T, B, Vp)
    alpha_ref[...] = jnp.stack(alphas, axis=0)       # (T, B, L)


def init_params(key, C, E, H, V):
    """Deterministic synthetic parameters. Linear weights stored as (in, out)."""
    ks = jax.random.split(key, 16)

    def lin(k, fan_in, fan_out):
        kw, kb = jax.random.split(k)
        w = 0.1 * jax.random.normal(kw, (fan_in, fan_out), jnp.float32)
        b = 0.1 * jax.random.normal(kb, (1, fan_out), jnp.float32)
        return w, b

    p = {}
    p['embedding'] = 0.1 * jax.random.normal(ks[0], (V, E), jnp.float32)
    p['w_proj'], p['b_proj'] = lin(ks[1], C, C)          # project_fc
    p['w_h0'], p['b_h0'] = lin(ks[2], C, H)              # init_h0_fc
    p['w_lo'], p['b_lo'] = lin(ks[3], E, V)              # Lo_fc
    p['w_lh'], p['b_lh'] = lin(ks[4], H, E)              # Lh_fc
    p['w_atth'], p['b_atth'] = lin(ks[5], H, C)          # att_h_fc
    w_attw, b_attw = lin(ks[6], C, 1)                    # att_w_fc
    p['w_attw'] = w_attw.T                               # (1, C)
    p['b_attw'] = b_attw                                 # (1, 1)
    # LSTM: weight_ih split by input layout x = concat(emb[E], context[C]); stored (in, 4H)
    p['w_ih_e'], _ = lin(ks[7], E, 4 * H)
    p['w_ih_z'], _ = lin(ks[8], C, 4 * H)
    p['w_hh'], _ = lin(ks[9], H, 4 * H)
    b_ih = 0.1 * jax.random.normal(ks[10], (1, 4 * H), jnp.float32)
    b_hh = 0.1 * jax.random.normal(ks[11], (1, 4 * H), jnp.float32)
    p['b_lstm'] = b_ih + b_hh
    # BatchNorm1d affine params
    p['gamma'] = 1.0 + 0.1 * jax.random.normal(ks[12], (1, C), jnp.float32)
    p['beta'] = 0.1 * jax.random.normal(ks[13], (1, C), jnp.float32)
    return p


def caption_lstm_forward(a, y_ids, params, num_steps):
    B, C, L = a.shape
    T = num_steps
    E = params['embedding'].shape[1]
    V = params['w_lo'].shape[1]
    Vp = ((V + 127) // 128) * 128        # pad vocab to a multiple of 128 lanes

    # Glue (XLA): embedding lookup, time-major layout, weight fusion / padding.
    y_emb = jnp.take(params['embedding'], y_ids, axis=0)        # (B, T, E)
    y_emb_t = jnp.transpose(y_emb, (1, 0, 2))                   # (T, B, E)

    # Fuse the three LSTM gate weights into one (E+C+H, 4H) matrix matching
    # the in-kernel activation ordering x = concat([emb, z, h], axis=1).
    w_gates = jnp.concatenate(
        [params['w_ih_e'], params['w_ih_z'], params['w_hh']], axis=0)

    # Zero-pad the vocab projection so pred stores are lane-dense (Vp % 128 == 0).
    w_lo_p = jnp.zeros((E, Vp), jnp.float32).at[:, :V].set(params['w_lo'])
    b_lo_p = jnp.zeros((1, Vp), jnp.float32).at[:, :V].set(params['b_lo'])

    # TODO(synk): at realistic sizes (v6e/v7x) cast weights to bf16 with f32 accumulation
    # and tile the vocab dim of w_lo/pred for v7x's 64 MiB VMEM; unnecessary at toy sizes.
    kernel_inputs = [
        a, y_emb_t, params['gamma'], params['beta'],
        params['w_h0'], params['b_h0'], params['w_proj'], params['b_proj'],
        params['w_atth'], params['b_atth'], params['w_attw'], params['b_attw'],
        w_gates, params['b_lstm'], params['w_lh'], params['b_lh'], w_lo_p, b_lo_p,
    ]

    # Single invocation (no grid): every operand fits comfortably in VMEM, the whole
    # recurrence runs in one kernel with one DMA in per input and one DMA out per output.
    pred_t, alpha_t = pl.pallas_call(
        _caption_kernel,
        out_shape=(
            jax.ShapeDtypeStruct((T, B, Vp), jnp.float32),
            jax.ShapeDtypeStruct((T, B, L), jnp.float32),
        ),
    )(*kernel_inputs)

    pred = jnp.transpose(pred_t[:, :, :V], (1, 0, 2))   # (B, T, V)
    alpha = jnp.transpose(alpha_t, (1, 0, 2))            # (B, T, L)
    return pred, alpha


def reference_forward(a, y_ids, params, num_steps):
    """Pure-JAX reference mirroring the PyTorch forward (eval dropout, train-mode BN)."""
    B, C, L = a.shape
    H = params['w_hh'].shape[0]
    y_emb = jnp.take(params['embedding'], y_ids, axis=0)
    h = jnp.tanh(jnp.mean(a, axis=2) @ params['w_h0'] + params['b_h0'])
    c = h
    mu = jnp.mean(a, axis=(0, 2), keepdims=True)
    var = jnp.mean(a * a, axis=(0, 2), keepdims=True) - mu * mu
    a_bn = ((a - mu) / jnp.sqrt(var + 1e-5) * params['gamma'][:, :, None]
            + params['beta'][:, :, None])
    a_proj = jnp.einsum('bcl,cd->bld', a_bn, params['w_proj']) + params['b_proj']
    preds, alphas = [], []
    for step in range(num_steps):
        h_att = jax.nn.relu((h @ params['w_atth'] + params['b_atth'])[:, None, :] + a_proj)
        out_att = jnp.sum(h_att * params['w_attw'][None, :, :], axis=-1) + params['b_attw']
        alpha = jax.nn.softmax(out_att, axis=-1)
        z = jnp.sum(a_bn * alpha[:, None, :], axis=2)
        emb = y_emb[:, step, :]
        gates = (emb @ params['w_ih_e'] + z @ params['w_ih_z'] + h @ params['w_hh']
                 + params['b_lstm'])
        i_g = jax.nn.sigmoid(gates[:, 0:H])
        f_g = jax.nn.sigmoid(gates[:, H:2 * H])
        g_g = jnp.tanh(gates[:, 2 * H:3 * H])
        o_g = jax.nn.sigmoid(gates[:, 3 * H:4 * H])
        c = f_g * c + i_g * g_g
        h = o_g * jnp.tanh(c)
        h_logits = jnp.tanh(h @ params['w_lh'] + params['b_lh'])
        preds.append(h_logits @ params['w_lo'] + params['b_lo'])
        alphas.append(alpha)
    return jnp.stack(preds, axis=1), jnp.stack(alphas, axis=1)


if __name__ == "__main__":
    B, C, L = 2, 8, 16        # batch, channel, spatial locations
    E, H, V = 16, 32, 64      # embedding_dim, hidden_size, vocab_size
    num_steps = 6

    key = jax.random.PRNGKey(0)
    k_a, k_y, k_p = jax.random.split(key, 3)
    a = jax.random.normal(k_a, (B, C, L), jnp.float32)
    y = jax.random.randint(k_y, (B, num_steps), 0, V, dtype=jnp.int32)
    params = init_params(k_p, C, E, H, V)

    pred, alpha = caption_lstm_forward(a, y, params, num_steps)
    pred = jax.block_until_ready(pred)
    alpha = jax.block_until_ready(alpha)

    pred_ref, alpha_ref = reference_forward(a, y, params, num_steps)
    assert pred.shape == (B, num_steps, V) and alpha.shape == (B, num_steps, L)
    # Tolerance accounts for pl.reciprocal(approx=True) in the softmax (EUP precision).
    assert jnp.allclose(pred, pred_ref, atol=5e-3, rtol=5e-3)
    assert jnp.allclose(alpha, alpha_ref, atol=5e-3, rtol=5e-3)
    print("KERNEL_OK")
</pallas_src>

<mosaic_0001>
module attributes {stable_mosaic.version = 11 : i64} {
  func.func @_caption_kernel(%arg0: memref<2x8x16xf32, #tpu.memory_space<vmem>>, %arg1: memref<6x2x16xf32, #tpu.memory_space<vmem>>, %arg2: memref<1x8xf32, #tpu.memory_space<vmem>>, %arg3: memref<1x8xf32, #tpu.memory_space<vmem>>, %arg4: memref<8x32xf32, #tpu.memory_space<vmem>>, %arg5: memref<1x32xf32, #tpu.memory_space<vmem>>, %arg6: memref<8x8xf32, #tpu.memory_space<vmem>>, %arg7: memref<1x8xf32, #tpu.memory_space<vmem>>, %arg8: memref<32x8xf32, #tpu.memory_space<vmem>>, %arg9: memref<1x8xf32, #tpu.memory_space<vmem>>, %arg10: memref<1x8xf32, #tpu.memory_space<vmem>>, %arg11: memref<1x1xf32, #tpu.memory_space<vmem>>, %arg12: memref<56x128xf32, #tpu.memory_space<vmem>>, %arg13: memref<1x128xf32, #tpu.memory_space<vmem>>, %arg14: memref<32x16xf32, #tpu.memory_space<vmem>>, %arg15: memref<1x16xf32, #tpu.memory_space<vmem>>, %arg16: memref<16x128xf32, #tpu.memory_space<vmem>>, %arg17: memref<1x128xf32, #tpu.memory_space<vmem>>, %arg18: memref<6x2x128xf32, #tpu.memory_space<vmem>>, %arg19: memref<6x2x16xf32, #tpu.memory_space<vmem>>) attributes {dimension_semantics = [], scalar_prefetch = 0 : i64, scratch_operands = 0 : i64, tpu.core_type = #tpu.core_type<tc>} {
    %c0 = arith.constant 0 : index
    %c0_0 = arith.constant 0 : index
    %c0_1 = arith.constant 0 : index
    %0 = vector.load %arg0[%c0, %c0_0, %c0_1] : memref<2x8x16xf32, #tpu.memory_space<vmem>>, vector<2x8x16xf32>
    %c0_2 = arith.constant 0 : index
    %c0_3 = arith.constant 0 : index
    %1 = vector.load %arg2[%c0_2, %c0_3] : memref<1x8xf32, #tpu.memory_space<vmem>>, vector<1x8xf32>
    %c0_4 = arith.constant 0 : index
    %c0_5 = arith.constant 0 : index
    %2 = vector.load %arg3[%c0_4, %c0_5] : memref<1x8xf32, #tpu.memory_space<vmem>>, vector<1x8xf32>
    %c0_6 = arith.constant 0 : index
    %c0_7 = arith.constant 0 : index
    %3 = vector.load %arg4[%c0_6, %c0_7] : memref<8x32xf32, #tpu.memory_space<vmem>>, vector<8x32xf32>
    %c0_8 = arith.constant 0 : index
    %c0_9 = arith.constant 0 : index
    %4 = vector.load %arg5[%c0_8, %c0_9] : memref<1x32xf32, #tpu.memory_space<vmem>>, vector<1x32xf32>
    %c0_10 = arith.constant 0 : index
    %c0_11 = arith.constant 0 : index
    %5 = vector.load %arg6[%c0_10, %c0_11] : memref<8x8xf32, #tpu.memory_space<vmem>>, vector<8x8xf32>
    %c0_12 = arith.constant 0 : index
    %c0_13 = arith.constant 0 : index
    %6 = vector.load %arg7[%c0_12, %c0_13] : memref<1x8xf32, #tpu.memory_space<vmem>>, vector<1x8xf32>
    %c0_14 = arith.constant 0 : index
    %c0_15 = arith.constant 0 : index
    %7 = vector.load %arg8[%c0_14, %c0_15] : memref<32x8xf32, #tpu.memory_space<vmem>>, vector<32x8xf32>
    %c0_16 = arith.constant 0 : index
    %c0_17 = arith.constant 0 : index
    %8 = vector.load %arg9[%c0_16, %c0_17] : memref<1x8xf32, #tpu.memory_space<vmem>>, vector<1x8xf32>
    %c0_18 = arith.constant 0 : index
    %c0_19 = arith.constant 0 : index
    %9 = vector.load %arg10[%c0_18, %c0_19] : memref<1x8xf32, #tpu.memory_space<vmem>>, vector<1x8xf32>
    %c0_20 = arith.constant 0 : index
    %c0_21 = arith.constant 0 : index
    %10 = vector.load %arg11[%c0_20, %c0_21] : memref<1x1xf32, #tpu.memory_space<vmem>>, vector<1x1xf32>
    %c0_22 = arith.constant 0 : index
    %c0_23 = arith.constant 0 : index
    %11 = vector.load %arg12[%c0_22, %c0_23] : memref<56x128xf32, #tpu.memory_space<vmem>>, vector<56x128xf32>
    %c0_24 = arith.constant 0 : index
    %c0_25 = arith.constant 0 : index
    %12 = vector.load %arg13[%c0_24, %c0_25] : memref<1x128xf32, #tpu.memory_space<vmem>>, vector<1x128xf32>
    %c0_26 = arith.constant 0 : index
    %c0_27 = arith.constant 0 : index
    %13 = vector.load %arg14[%c0_26, %c0_27] : memref<32x16xf32, #tpu.memory_space<vmem>>, vector<32x16xf32>
    %c0_28 = arith.constant 0 : index
    %c0_29 = arith.constant 0 : index
    %14 = vector.load %arg15[%c0_28, %c0_29] : memref<1x16xf32, #tpu.memory_space<vmem>>, vector<1x16xf32>
    %c0_30 = arith.constant 0 : index
    %c0_31 = arith.constant 0 : index
    %15 = vector.load %arg16[%c0_30, %c0_31] : memref<16x128xf32, #tpu.memory_space<vmem>>, vector<16x128xf32>
    %c0_32 = arith.constant 0 : index
    %c0_33 = arith.constant 0 : index
    %16 = vector.load %arg17[%c0_32, %c0_33] : memref<1x128xf32, #tpu.memory_space<vmem>>, vector<1x128xf32>
    %cst = arith.constant dense<0.000000e+00> : vector<2x8xf32>
    %17 = vector.multi_reduction <add>, %0, %cst [2] : vector<2x8x16xf32> to vector<2x8xf32>
    %18 = vector.shape_cast %17 : vector<2x8xf32> to vector<2x8x1xf32>
    %cst_34 = arith.constant 1.600000e+01 : f32
    %19 = vector.broadcast %cst_34 : f32 to vector<2x8x1xf32>
    %20 = arith.divf %18, %19 : vector<2x8x1xf32>
    %21 = vector.shape_cast %20 : vector<2x8x1xf32> to vector<2x8xf32>
    %cst_35 = arith.constant dense<0.000000e+00> : vector<2x32xf32>
    %22 = tpu.matmul %21, %3, %cst_35 {dimension_numbers = #tpu.dot_dimension_numbers<[1], [0], [0], [1], [0, 0, 1, 1], [], []>} : vector<2x8xf32>, vector<8x32xf32>, vector<2x32xf32> -> vector<2x32xf32>
    %23 = vector.broadcast %4 : vector<1x32xf32> to vector<2x32xf32>
    %24 = arith.addf %22, %23 : vector<2x32xf32>
    %25 = math.tanh %24 : vector<2x32xf32>
    %cst_36 = arith.constant dense<0.000000e+00> : vector<8x1xf32>
    %26 = vector.multi_reduction <add>, %20, %cst_36 [0] : vector<2x8x1xf32> to vector<8x1xf32>
    %27 = vector.shape_cast %26 : vector<8x1xf32> to vector<1x8x1xf32>
    %cst_37 = arith.constant 2.000000e+00 : f32
    %28 = vector.broadcast %cst_37 : f32 to vector<1x8x1xf32>
    %29 = arith.divf %27, %28 : vector<1x8x1xf32>
    %30 = arith.mulf %0, %0 : vector<2x8x16xf32>
    %cst_38 = arith.constant dense<0.000000e+00> : vector<2x8xf32>
    %31 = vector.multi_reduction <add>, %30, %cst_38 [2] : vector<2x8x16xf32> to vector<2x8xf32>
    %32 = vector.shape_cast %31 : vector<2x8xf32> to vector<2x8x1xf32>
    %cst_39 = arith.constant 1.600000e+01 : f32
    %33 = vector.broadcast %cst_39 : f32 to vector<2x8x1xf32>
    %34 = arith.divf %32, %33 : vector<2x8x1xf32>
    %cst_40 = arith.constant dense<0.000000e+00> : vector<8x1xf32>
    %35 = vector.multi_reduction <add>, %34, %cst_40 [0] : vector<2x8x1xf32> to vector<8x1xf32>
    %36 = vector.shape_cast %35 : vector<8x1xf32> to vector<1x8x1xf32>
    %cst_41 = arith.constant 2.000000e+00 : f32
    %37 = vector.broadcast %cst_41 : f32 to vector<1x8x1xf32>
    %38 = arith.divf %36, %37 : vector<1x8x1xf32>
    %39 = arith.mulf %29, %29 : vector<1x8x1xf32>
    %40 = arith.subf %38, %39 : vector<1x8x1xf32>
    %cst_42 = arith.constant 9.99999974E-6 : f32
    %41 = vector.broadcast %cst_42 : f32 to vector<1x8x1xf32>
    %42 = arith.addf %40, %41 : vector<1x8x1xf32>
    %43 = math.rsqrt %42 : vector<1x8x1xf32>
    %44 = vector.broadcast %29 : vector<1x8x1xf32> to vector<2x8x16xf32>
    %45 = arith.subf %0, %44 : vector<2x8x16xf32>
    %46 = vector.broadcast %43 : vector<1x8x1xf32> to vector<2x8x16xf32>
    %47 = arith.mulf %45, %46 : vector<2x8x16xf32>
    %48 = vector.shape_cast %1 : vector<1x8xf32> to vector<1x8x1xf32>
    %49 = vector.broadcast %48 : vector<1x8x1xf32> to vector<2x8x16xf32>
    %50 = arith.mulf %47, %49 : vector<2x8x16xf32>
    %51 = vector.shape_cast %2 : vector<1x8xf32> to vector<1x8x1xf32>
    %52 = vector.broadcast %51 : vector<1x8x1xf32> to vector<2x8x16xf32>
    %53 = arith.addf %50, %52 : vector<2x8x16xf32>
    %54 = vector.extract_strided_slice %53 {offsets = [0, 0, 0], sizes = [1, 8, 16], strides = [1, 1, 1]} : vector<2x8x16xf32> to vector<1x8x16xf32>
    %55 = vector.shape_cast %54 : vector<1x8x16xf32> to vector<8x16xf32>
    %56 = tpu.transpose %55, [1, 0] : vector<8x16xf32> -> vector<16x8xf32>
    %57 = vector.extract_strided_slice %53 {offsets = [1, 0, 0], sizes = [1, 8, 16], strides = [1, 1, 1]} : vector<2x8x16xf32> to vector<1x8x16xf32>
    %58 = vector.shape_cast %57 : vector<1x8x16xf32> to vector<8x16xf32>
    %59 = tpu.transpose %58, [1, 0] : vector<8x16xf32> -> vector<16x8xf32>
    %60 = vector.shape_cast %56 : vector<16x8xf32> to vector<1x16x8xf32>
    %61 = vector.shape_cast %59 : vector<16x8xf32> to vector<1x16x8xf32>
    %62 = tpu.concatenate %60, %61 in 0 : vector<1x16x8xf32>, vector<1x16x8xf32> -> vector<2x16x8xf32>
    %63 = vector.shape_cast %62 : vector<2x16x8xf32> to vector<32x8xf32>
    %cst_43 = arith.constant dense<0.000000e+00> : vector<32x8xf32>
    %64 = tpu.matmul %63, %5, %cst_43 {dimension_numbers = #tpu.dot_dimension_numbers<[1], [0], [0], [1], [0, 0, 1, 1], [], []>} : vector<32x8xf32>, vector<8x8xf32>, vector<32x8xf32> -> vector<32x8xf32>
    %65 = vector.shape_cast %64 : vector<32x8xf32> to vector<2x16x8xf32>
    %66 = vector.shape_cast %6 : vector<1x8xf32> to vector<1x1x8xf32>
    %67 = vector.broadcast %66 : vector<1x1x8xf32> to vector<2x16x8xf32>
    %68 = arith.addf %65, %67 : vector<2x16x8xf32>
    %c0_44 = arith.constant 0 : index
    %c0_45 = arith.constant 0 : index
    %c0_46 = arith.constant 0 : index
    %69 = vector.load %arg1[%c0_44, %c0_45, %c0_46] : memref<6x2x16xf32, #tpu.memory_space<vmem>>, vector<1x2x16xf32>
    %70 = vector.shape_cast %69 : vector<1x2x16xf32> to vector<2x16xf32>
    %cst_47 = arith.constant dense<0.000000e+00> : vector<2x8xf32>
    %71 = tpu.matmul %25, %7, %cst_47 {dimension_numbers = #tpu.dot_dimension_numbers<[1], [0], [0], [1], [0, 0, 1, 1], [], []>} : vector<2x32xf32>, vector<32x8xf32>, vector<2x8xf32> -> vector<2x8xf32>
    %72 = vector.broadcast %8 : vector<1x8xf32> to vector<2x8xf32>
    %73 = arith.addf %71, %72 : vector<2x8xf32>
    %74 = vector.shape_cast %73 : vector<2x8xf32> to vector<2x1x8xf32>
    %75 = vector.broadcast %74 : vector<2x1x8xf32> to vector<2x16x8xf32>
    %76 = arith.addf %75, %68 : vector<2x16x8xf32>
    %cst_48 = arith.constant 0.000000e+00 : f32
    %77 = vector.broadcast %cst_48 : f32 to vector<2x16x8xf32>
    %78 = arith.maximumf %76, %77 : vector<2x16x8xf32>
    %79 = vector.shape_cast %9 : vector<1x8xf32> to vector<1x1x8xf32>
    %80 = vector.broadcast %79 : vector<1x1x8xf32> to vector<2x16x8xf32>
    %81 = arith.mulf %78, %80 : vector<2x16x8xf32>
    %cst_49 = arith.constant dense<0.000000e+00> : vector<2x16xf32>
    %82 = vector.multi_reduction <add>, %81, %cst_49 [2] : vector<2x16x8xf32> to vector<2x16xf32>
    %83 = vector.broadcast %10 : vector<1x1xf32> to vector<2x16xf32>
    %84 = arith.addf %82, %83 : vector<2x16xf32>
    %cst_50 = arith.constant dense<0xFF800000> : vector<2xf32>
    %85 = vector.multi_reduction <maximumf>, %84, %cst_50 [1] : vector<2x16xf32> to vector<2xf32>
    %86 = vector.shape_cast %85 : vector<2xf32> to vector<2x1xf32>
    %87 = vector.broadcast %86 : vector<2x1xf32> to vector<2x16xf32>
    %88 = arith.subf %84, %87 : vector<2x16xf32>
    %89 = math.exp %88 : vector<2x16xf32>
    %cst_51 = arith.constant dense<0.000000e+00> : vector<2xf32>
    %90 = vector.multi_reduction <add>, %89, %cst_51 [1] : vector<2x16xf32> to vector<2xf32>
    %91 = vector.shape_cast %90 : vector<2xf32> to vector<2x1xf32>
    %92 = tpu.reciprocal %91 {approx = true} : vector<2x1xf32> -> vector<2x1xf32>
    %93 = vector.broadcast %92 : vector<2x1xf32> to vector<2x16xf32>
    %94 = arith.mulf %89, %93 : vector<2x16xf32>
    %95 = vector.shape_cast %94 : vector<2x16xf32> to vector<2x1x16xf32>
    %96 = vector.broadcast %95 : vector<2x1x16xf32> to vector<2x8x16xf32>
    %97 = arith.mulf %53, %96 : vector<2x8x16xf32>
    %cst_52 = arith.constant dense<0.000000e+00> : vector<2x8xf32>
    %98 = vector.multi_reduction <add>, %97, %cst_52 [2] : vector<2x8x16xf32> to vector<2x8xf32>
    %99 = tpu.concatenate %70, %98, %25 in 1 : vector<2x16xf32>, vector<2x8xf32>, vector<2x32xf32> -> vector<2x56xf32>
    %cst_53 = arith.constant dense<0.000000e+00> : vector<2x128xf32>
    %100 = tpu.matmul %99, %11, %cst_53 {dimension_numbers = #tpu.dot_dimension_numbers<[1], [0], [0], [1], [0, 0, 1, 1], [], []>} : vector<2x56xf32>, vector<56x128xf32>, vector<2x128xf32> -> vector<2x128xf32>
    %101 = vector.broadcast %12 : vector<1x128xf32> to vector<2x128xf32>
    %102 = arith.addf %100, %101 : vector<2x128xf32>
    %103 = arith.negf %102 : vector<2x128xf32>
    %104 = math.exp %103 : vector<2x128xf32>
    %cst_54 = arith.constant 1.000000e+00 : f32
    %105 = vector.broadcast %cst_54 : f32 to vector<2x128xf32>
    %106 = arith.addf %105, %104 : vector<2x128xf32>
    %107 = arith.divf %105, %106 : vector<2x128xf32>
    %108 = math.tanh %102 : vector<2x128xf32>
    %109 = vector.extract_strided_slice %107 {offsets = [0, 0], sizes = [2, 32], strides = [1, 1]} : vector<2x128xf32> to vector<2x32xf32>
    %110 = vector.extract_strided_slice %107 {offsets = [0, 32], sizes = [2, 32], strides = [1, 1]} : vector<2x128xf32> to vector<2x32xf32>
    %111 = vector.extract_strided_slice %108 {offsets = [0, 64], sizes = [2, 32], strides = [1, 1]} : vector<2x128xf32> to vector<2x32xf32>
    %112 = vector.extract_strided_slice %107 {offsets = [0, 96], sizes = [2, 32], strides = [1, 1]} : vector<2x128xf32> to vector<2x32xf32>
    %113 = arith.mulf %110, %25 : vector<2x32xf32>
    %114 = arith.mulf %109, %111 : vector<2x32xf32>
    %115 = arith.addf %113, %114 : vector<2x32xf32>
    %116 = math.tanh %115 : vector<2x32xf32>
    %117 = arith.mulf %112, %116 : vector<2x32xf32>
    %cst_55 = arith.constant dense<0.000000e+00> : vector<2x16xf32>
    %118 = tpu.matmul %117, %13, %cst_55 {dimension_numbers = #tpu.dot_dimension_numbers<[1], [0], [0], [1], [0, 0, 1, 1], [], []>} : vector<2x32xf32>, vector<32x16xf32>, vector<2x16xf32> -> vector<2x16xf32>
    %119 = vector.broadcast %14 : vector<1x16xf32> to vector<2x16xf32>
    %120 = arith.addf %118, %119 : vector<2x16xf32>
    %121 = math.tanh %120 : vector<2x16xf32>
    %cst_56 = arith.constant dense<0.000000e+00> : vector<2x128xf32>
    %122 = tpu.matmul %121, %15, %cst_56 {dimension_numbers = #tpu.dot_dimension_numbers<[1], [0], [0], [1], [0, 0, 1, 1], [], []>} : vector<2x16xf32>, vector<16x128xf32>, vector<2x128xf32> -> vector<2x128xf32>
    %123 = vector.broadcast %16 : vector<1x128xf32> to vector<2x128xf32>
    %124 = arith.addf %122, %123 : vector<2x128xf32>
    %c1 = arith.constant 1 : index
    %c0_57 = arith.constant 0 : index
    %c0_58 = arith.constant 0 : index
    %125 = vector.load %arg1[%c1, %c0_57, %c0_58] : memref<6x2x16xf32, #tpu.memory_space<vmem>>, vector<1x2x16xf32>
    %126 = vector.shape_cast %125 : vector<1x2x16xf32> to vector<2x16xf32>
    %cst_59 = arith.constant dense<0.000000e+00> : vector<2x8xf32>
    %127 = tpu.matmul %117, %7, %cst_59 {dimension_numbers = #tpu.dot_dimension_numbers<[1], [0], [0], [1], [0, 0, 1, 1], [], []>} : vector<2x32xf32>, vector<32x8xf32>, vector<2x8xf32> -> vector<2x8xf32>
    %128 = vector.broadcast %8 : vector<1x8xf32> to vector<2x8xf32>
    %129 = arith.addf %127, %128 : vector<2x8xf32>
    %130 = vector.shape_cast %129 : vector<2x8xf32> to vector<2x1x8xf32>
    %131 = vector.broadcast %130 : vector<2x1x8xf32> to vector<2x16x8xf32>
    %132 = arith.addf %131, %68 : vector<2x16x8xf32>
    %cst_60 = arith.constant 0.000000e+00 : f32
    %133 = vector.broadcast %cst_60 : f32 to vector<2x16x8xf32>
    %134 = arith.maximumf %132, %133 : vector<2x16x8xf32>
    %135 = vector.shape_cast %9 : vector<1x8xf32> to vector<1x1x8xf32>
    %136 = vector.broadcast %135 : vector<1x1x8xf32> to vector<2x16x8xf32>
    %137 = arith.mulf %134, %136 : vector<2x16x8xf32>
    %cst_61 = arith.constant dense<0.000000e+00> : vector<2x16xf32>
    %138 = vector.multi_reduction <add>, %137, %cst_61 [2] : vector<2x16x8xf32> to vector<2x16xf32>
    %139 = vector.broadcast %10 : vector<1x1xf32> to vector<2x16xf32>
    %140 = arith.addf %138, %139 : vector<2x16xf32>
    %cst_62 = arith.constant dense<0xFF800000> : vector<2xf32>
    %141 = vector.multi_reduction <maximumf>, %140, %cst_62 [1] : vector<2x16xf32> to vector<2xf32>
    %142 = vector.shape_cast %141 : vector<2xf32> to vector<2x1xf32>
    %143 = vector.broadcast %142 : vector<2x1xf32> to vector<2x16xf32>
    %144 = arith.subf %140, %143 : vector<2x16xf32>
    %145 = math.exp %144 : vector<2x16xf32>
    %cst_63 = arith.constant dense<0.000000e+00> : vector<2xf32>
    %146 = vector.multi_reduction <add>, %145, %cst_63 [1] : vector<2x16xf32> to vector<2xf32>
    %147 = vector.shape_cast %146 : vector<2xf32> to vector<2x1xf32>
    %148 = tpu.reciprocal %147 {approx = true} : vector<2x1xf32> -> vector<2x1xf32>
    %149 = vector.broadcast %148 : vector<2x1xf32> to vector<2x16xf32>
    %150 = arith.mulf %145, %149 : vector<2x16xf32>
    %151 = vector.shape_cast %150 : vector<2x16xf32> to vector<2x1x16xf32>
    %152 = vector.broadcast %151 : vector<2x1x16xf32> to vector<2x8x16xf32>
    %153 = arith.mulf %53, %152 : vector<2x8x16xf32>
    %cst_64 = arith.constant dense<0.000000e+00> : vector<2x8xf32>
    %154 = vector.multi_reduction <add>, %153, %cst_64 [2] : vector<2x8x16xf32> to vector<2x8xf32>
    %155 = tpu.concatenate %126, %154, %117 in 1 : vector<2x16xf32>, vector<2x8xf32>, vector<2x32xf32> -> vector<2x56xf32>
    %cst_65 = arith.constant dense<0.000000e+00> : vector<2x128xf32>
    %156 = tpu.matmul %155, %11, %cst_65 {dimension_numbers = #tpu.dot_dimension_numbers<[1], [0], [0], [1], [0, 0, 1, 1], [], []>} : vector<2x56xf32>, vector<56x128xf32>, vector<2x128xf32> -> vector<2x128xf32>
    %157 = vector.broadcast %12 : vector<1x128xf32> to vector<2x128xf32>
    %158 = arith.addf %156, %157 : vector<2x128xf32>
    %159 = arith.negf %158 : vector<2x128xf32>
    %160 = math.exp %159 : vector<2x128xf32>
    %cst_66 = arith.constant 1.000000e+00 : f32
    %161 = vector.broadcast %cst_66 : f32 to vector<2x128xf32>
    %162 = arith.addf %161, %160 : vector<2x128xf32>
    %163 = arith.divf %161, %162 : vector<2x128xf32>
    %164 = math.tanh %158 : vector<2x128xf32>
    %165 = vector.extract_strided_slice %163 {offsets = [0, 0], sizes = [2, 32], strides = [1, 1]} : vector<2x128xf32> to vector<2x32xf32>
    %166 = vector.extract_strided_slice %163 {offsets = [0, 32], sizes = [2, 32], strides = [1, 1]} : vector<2x128xf32> to vector<2x32xf32>
    %167 = vector.extract_strided_slice %164 {offsets = [0, 64], sizes = [2, 32], strides = [1, 1]} : vector<2x128xf32> to vector<2x32xf32>
    %168 = vector.extract_strided_slice %163 {offsets = [0, 96], sizes = [2, 32], strides = [1, 1]} : vector<2x128xf32> to vector<2x32xf32>
    %169 = arith.mulf %166, %115 : vector<2x32xf32>
    %170 = arith.mulf %165, %167 : vector<2x32xf32>
    %171 = arith.addf %169, %170 : vector<2x32xf32>
    %172 = math.tanh %171 : vector<2x32xf32>
    %173 = arith.mulf %168, %172 : vector<2x32xf32>
    %cst_67 = arith.constant dense<0.000000e+00> : vector<2x16xf32>
    %174 = tpu.matmul %173, %13, %cst_67 {dimension_numbers = #tpu.dot_dimension_numbers<[1], [0], [0], [1], [0, 0, 1, 1], [], []>} : vector<2x32xf32>, vector<32x16xf32>, vector<2x16xf32> -> vector<2x16xf32>
    %175 = vector.broadcast %14 : vector<1x16xf32> to vector<2x16xf32>
    %176 = arith.addf %174, %175 : vector<2x16xf32>
    %177 = math.tanh %176 : vector<2x16xf32>
    %cst_68 = arith.constant dense<0.000000e+00> : vector<2x128xf32>
    %178 = tpu.matmul %177, %15, %cst_68 {dimension_numbers = #tpu.dot_dimension_numbers<[1], [0], [0], [1], [0, 0, 1, 1], [], []>} : vector<2x16xf32>, vector<16x128xf32>, vector<2x128xf32> -> vector<2x128xf32>
    %179 = vector.broadcast %16 : vector<1x128xf32> to vector<2x128xf32>
    %180 = arith.addf %178, %179 : vector<2x128xf32>
    %c2 = arith.constant 2 : index
    %c0_69 = arith.constant 0 : index
    %c0_70 = arith.constant 0 : index
    %181 = vector.load %arg1[%c2, %c0_69, %c0_70] : memref<6x2x16xf32, #tpu.memory_space<vmem>>, vector<1x2x16xf32>
    %182 = vector.shape_cast %181 : vector<1x2x16xf32> to vector<2x16xf32>
    %cst_71 = arith.constant dense<0.000000e+00> : vector<2x8xf32>
    %183 = tpu.matmul %173, %7, %cst_71 {dimension_numbers = #tpu.dot_dimension_numbers<[1], [0], [0], [1], [0, 0, 1, 1], [], []>} : vector<2x32xf32>, vector<32x8xf32>, vector<2x8xf32> -> vector<2x8xf32>
    %184 = vector.broadcast %8 : vector<1x8xf32> to vector<2x8xf32>
    %185 = arith.addf %183, %184 : vector<2x8xf32>
    %186 = vector.shape_cast %185 : vector<2x8xf32> to vector<2x1x8xf32>
    %187 = vector.broadcast %186 : vector<2x1x8xf32> to vector<2x16x8xf32>
    %188 = arith.addf %187, %68 : vector<2x16x8xf32>
    %cst_72 = arith.constant 0.000000e+00 : f32
    %189 = vector.broadcast %cst_72 : f32 to vector<2x16x8xf32>
    %190 = arith.maximumf %188, %189 : vector<2x16x8xf32>
    %191 = vector.shape_cast %9 : vector<1x8xf32> to vector<1x1x8xf32>
    %192 = vector.broadcast %191 : vector<1x1x8xf32> to vector<2x16x8xf32>
    %193 = arith.mulf %190, %192 : vector<2x16x8xf32>
    %cst_73 = arith.constant dense<0.000000e+00> : vector<2x16xf32>
    %194 = vector.multi_reduction <add>, %193, %cst_73 [2] : vector<2x16x8xf32> to vector<2x16xf32>
    %195 = vector.broadcast %10 : vector<1x1xf32> to vector<2x16xf32>
    %196 = arith.addf %194, %195 : vector<2x16xf32>
    %cst_74 = arith.constant dense<0xFF800000> : vector<2xf32>
    %197 = vector.multi_reduction <maximumf>, %196, %cst_74 [1] : vector<2x16xf32> to vector<2xf32>
    %198 = vector.shape_cast %197 : vector<2xf32> to vector<2x1xf32>
    %199 = vector.broadcast %198 : vector<2x1xf32> to vector<2x16xf32>
    %200 = arith.subf %196, %199 : vector<2x16xf32>
    %201 = math.exp %200 : vector<2x16xf32>
    %cst_75 = arith.constant dense<0.000000e+00> : vector<2xf32>
    %202 = vector.multi_reduction <add>, %201, %cst_75 [1] : vector<2x16xf32> to vector<2xf32>
    %203 = vector.shape_cast %202 : vector<2xf32> to vector<2x1xf32>
    %204 = tpu.reciprocal %203 {approx = true} : vector<2x1xf32> -> vector<2x1xf32>
    %205 = vector.broadcast %204 : vector<2x1xf32> to vector<2x16xf32>
    %206 = arith.mulf %201, %205 : vector<2x16xf32>
    %207 = vector.shape_cast %206 : vector<2x16xf32> to vector<2x1x16xf32>
    %208 = vector.broadcast %207 : vector<2x1x16xf32> to vector<2x8x16xf32>
    %209 = arith.mulf %53, %208 : vector<2x8x16xf32>
    %cst_76 = arith.constant dense<0.000000e+00> : vector<2x8xf32>
    %210 = vector.multi_reduction <add>, %209, %cst_76 [2] : vector<2x8x16xf32> to vector<2x8xf32>
    %211 = tpu.concatenate %182, %210, %173 in 1 : vector<2x16xf32>, vector<2x8xf32>, vector<2x32xf32> -> vector<2x56xf32>
    %cst_77 = arith.constant dense<0.000000e+00> : vector<2x128xf32>
    %212 = tpu.matmul %211, %11, %cst_77 {dimension_numbers = #tpu.dot_dimension_numbers<[1], [0], [0], [1], [0, 0, 1, 1], [], []>} : vector<2x56xf32>, vector<56x128xf32>, vector<2x128xf32> -> vector<2x128xf32>
    %213 = vector.broadcast %12 : vector<1x128xf32> to vector<2x128xf32>
    %214 = arith.addf %212, %213 : vector<2x128xf32>
    %215 = arith.negf %214 : vector<2x128xf32>
    %216 = math.exp %215 : vector<2x128xf32>
    %cst_78 = arith.constant 1.000000e+00 : f32
    %217 = vector.broadcast %cst_78 : f32 to vector<2x128xf32>
    %218 = arith.addf %217, %216 : vector<2x128xf32>
    %219 = arith.divf %217, %218 : vector<2x128xf32>
    %220 = math.tanh %214 : vector<2x128xf32>
    %221 = vector.extract_strided_slice %219 {offsets = [0, 0], sizes = [2, 32], strides = [1, 1]} : vector<2x128xf32> to vector<2x32xf32>
    %222 = vector.extract_strided_slice %219 {offsets = [0, 32], sizes = [2, 32], strides = [1, 1]} : vector<2x128xf32> to vector<2x32xf32>
    %223 = vector.extract_strided_slice %220 {offsets = [0, 64], sizes = [2, 32], strides = [1, 1]} : vector<2x128xf32> to vector<2x32xf32>
    %224 = vector.extract_strided_slice %219 {offsets = [0, 96], sizes = [2, 32], strides = [1, 1]} : vector<2x128xf32> to vector<2x32xf32>
    %225 = arith.mulf %222, %171 : vector<2x32xf32>
    %226 = arith.mulf %221, %223 : vector<2x32xf32>
    %227 = arith.addf %225, %226 : vector<2x32xf32>
    %228 = math.tanh %227 : vector<2x32xf32>
    %229 = arith.mulf %224, %228 : vector<2x32xf32>
    %cst_79 = arith.constant dense<0.000000e+00> : vector<2x16xf32>
    %230 = tpu.matmul %229, %13, %cst_79 {dimension_numbers = #tpu.dot_dimension_numbers<[1], [0], [0], [1], [0, 0, 1, 1], [], []>} : vector<2x32xf32>, vector<32x16xf32>, vector<2x16xf32> -> vector<2x16xf32>
    %231 = vector.broadcast %14 : vector<1x16xf32> to vector<2x16xf32>
    %232 = arith.addf %230, %231 : vector<2x16xf32>
    %233 = math.tanh %232 : vector<2x16xf32>
    %cst_80 = arith.constant dense<0.000000e+00> : vector<2x128xf32>
    %234 = tpu.matmul %233, %15, %cst_80 {dimension_numbers = #tpu.dot_dimension_numbers<[1], [0], [0], [1], [0, 0, 1, 1], [], []>} : vector<2x16xf32>, vector<16x128xf32>, vector<2x128xf32> -> vector<2x128xf32>
    %235 = vector.broadcast %16 : vector<1x128xf32> to vector<2x128xf32>
    %236 = arith.addf %234, %235 : vector<2x128xf32>
    %c3 = arith.constant 3 : index
    %c0_81 = arith.constant 0 : index
    %c0_82 = arith.constant 0 : index
    %237 = vector.load %arg1[%c3, %c0_81, %c0_82] : memref<6x2x16xf32, #tpu.memory_space<vmem>>, vector<1x2x16xf32>
    %238 = vector.shape_cast %237 : vector<1x2x16xf32> to vector<2x16xf32>
    %cst_83 = arith.constant dense<0.000000e+00> : vector<2x8xf32>
    %239 = tpu.matmul %229, %7, %cst_83 {dimension_numbers = #tpu.dot_dimension_numbers<[1], [0], [0], [1], [0, 0, 1, 1], [], []>} : vector<2x32xf32>, vector<32x8xf32>, vector<2x8xf32> -> vector<2x8xf32>
    %240 = vector.broadcast %8 : vector<1x8xf32> to vector<2x8xf32>
    %241 = arith.addf %239, %240 : vector<2x8xf32>
    %242 = vector.shape_cast %241 : vector<2x8xf32> to vector<2x1x8xf32>
    %243 = vector.broadcast %242 : vector<2x1x8xf32> to vector<2x16x8xf32>
    %244 = arith.addf %243, %68 : vector<2x16x8xf32>
    %cst_84 = arith.constant 0.000000e+00 : f32
    %245 = vector.broadcast %cst_84 : f32 to vector<2x16x8xf32>
    %246 = arith.maximumf %244, %245 : vector<2x16x8xf32>
    %247 = vector.shape_cast %9 : vector<1x8xf32> to vector<1x1x8xf32>
    %248 = vector.broadcast %247 : vector<1x1x8xf32> to vector<2x16x8xf32>
    %249 = arith.mulf %246, %248 : vector<2x16x8xf32>
    %cst_85 = arith.constant dense<0.000000e+00> : vector<2x16xf32>
    %250 = vector.multi_reduction <add>, %249, %cst_85 [2] : vector<2x16x8xf32> to vector<2x16xf32>
    %251 = vector.broadcast %10 : vector<1x1xf32> to vector<2x16xf32>
    %252 = arith.addf %250, %251 : vector<2x16xf32>
    %cst_86 = arith.constant dense<0xFF800000> : vector<2xf32>
    %253 = vector.multi_reduction <maximumf>, %252, %cst_86 [1] : vector<2x16xf32> to vector<2xf32>
    %254 = vector.shape_cast %253 : vector<2xf32> to vector<2x1xf32>
    %255 = vector.broadcast %254 : vector<2x1xf32> to vector<2x16xf32>
    %256 = arith.subf %252, %255 : vector<2x16xf32>
    %257 = math.exp %256 : vector<2x16xf32>
    %cst_87 = arith.constant dense<0.000000e+00> : vector<2xf32>
    %258 = vector.multi_reduction <add>, %257, %cst_87 [1] : vector<2x16xf32> to vector<2xf32>
    %259 = vector.shape_cast %258 : vector<2xf32> to vector<2x1xf32>
    %260 = tpu.reciprocal %259 {approx = true} : vector<2x1xf32> -> vector<2x1xf32>
    %261 = vector.broadcast %260 : vector<2x1xf32> to vector<2x16xf32>
    %262 = arith.mulf %257, %261 : vector<2x16xf32>
    %263 = vector.shape_cast %262 : vector<2x16xf32> to vector<2x1x16xf32>
    %264 = vector.broadcast %263 : vector<2x1x16xf32> to vector<2x8x16xf32>
    %265 = arith.mulf %53, %264 : vector<2x8x16xf32>
    %cst_88 = arith.constant dense<0.000000e+00> : vector<2x8xf32>
    %266 = vector.multi_reduction <add>, %265, %cst_88 [2] : vector<2x8x16xf32> to vector<2x8xf32>
    %267 = tpu.concatenate %238, %266, %229 in 1 : vector<2x16xf32>, vector<2x8xf32>, vector<2x32xf32> -> vector<2x56xf32>
    %cst_89 = arith.constant dense<0.000000e+00> : vector<2x128xf32>
    %268 = tpu.matmul %267, %11, %cst_89 {dimension_numbers = #tpu.dot_dimension_numbers<[1], [0], [0], [1], [0, 0, 1, 1], [], []>} : vector<2x56xf32>, vector<56x128xf32>, vector<2x128xf32> -> vector<2x128xf32>
    %269 = vector.broadcast %12 : vector<1x128xf32> to vector<2x128xf32>
    %270 = arith.addf %268, %269 : vector<2x128xf32>
    %271 = arith.negf %270 : vector<2x128xf32>
    %272 = math.exp %271 : vector<2x128xf32>
    %cst_90 = arith.constant 1.000000e+00 : f32
    %273 = vector.broadcast %cst_90 : f32 to vector<2x128xf32>
    %274 = arith.addf %273, %272 : vector<2x128xf32>
    %275 = arith.divf %273, %274 : vector<2x128xf32>
    %276 = math.tanh %270 : vector<2x128xf32>
    %277 = vector.extract_strided_slice %275 {offsets = [0, 0], sizes = [2, 32], strides = [1, 1]} : vector<2x128xf32> to vector<2x32xf32>
    %278 = vector.extract_strided_slice %275 {offsets = [0, 32], sizes = [2, 32], strides = [1, 1]} : vector<2x128xf32> to vector<2x32xf32>
    %279 = vector.extract_strided_slice %276 {offsets = [0, 64], sizes = [2, 32], strides = [1, 1]} : vector<2x128xf32> to vector<2x32xf32>
    %280 = vector.extract_strided_slice %275 {offsets = [0, 96], sizes = [2, 32], strides = [1, 1]} : vector<2x128xf32> to vector<2x32xf32>
    %281 = arith.mulf %278, %227 : vector<2x32xf32>
    %282 = arith.mulf %277, %279 : vector<2x32xf32>
    %283 = arith.addf %281, %282 : vector<2x32xf32>
    %284 = math.tanh %283 : vector<2x32xf32>
    %285 = arith.mulf %280, %284 : vector<2x32xf32>
    %cst_91 = arith.constant dense<0.000000e+00> : vector<2x16xf32>
    %286 = tpu.matmul %285, %13, %cst_91 {dimension_numbers = #tpu.dot_dimension_numbers<[1], [0], [0], [1], [0, 0, 1, 1], [], []>} : vector<2x32xf32>, vector<32x16xf32>, vector<2x16xf32> -> vector<2x16xf32>
    %287 = vector.broadcast %14 : vector<1x16xf32> to vector<2x16xf32>
    %288 = arith.addf %286, %287 : vector<2x16xf32>
    %289 = math.tanh %288 : vector<2x16xf32>
    %cst_92 = arith.constant dense<0.000000e+00> : vector<2x128xf32>
    %290 = tpu.matmul %289, %15, %cst_92 {dimension_numbers = #tpu.dot_dimension_numbers<[1], [0], [0], [1], [0, 0, 1, 1], [], []>} : vector<2x16xf32>, vector<16x128xf32>, vector<2x128xf32> -> vector<2x128xf32>
    %291 = vector.broadcast %16 : vector<1x128xf32> to vector<2x128xf32>
    %292 = arith.addf %290, %291 : vector<2x128xf32>
    %c4 = arith.constant 4 : index
    %c0_93 = arith.constant 0 : index
    %c0_94 = arith.constant 0 : index
    %293 = vector.load %arg1[%c4, %c0_93, %c0_94] : memref<6x2x16xf32, #tpu.memory_space<vmem>>, vector<1x2x16xf32>
    %294 = vector.shape_cast %293 : vector<1x2x16xf32> to vector<2x16xf32>
    %cst_95 = arith.constant dense<0.000000e+00> : vector<2x8xf32>
    %295 = tpu.matmul %285, %7, %cst_95 {dimension_numbers = #tpu.dot_dimension_numbers<[1], [0], [0], [1], [0, 0, 1, 1], [], []>} : vector<2x32xf32>, vector<32x8xf32>, vector<2x8xf32> -> vector<2x8xf32>
    %296 = vector.broadcast %8 : vector<1x8xf32> to vector<2x8xf32>
    %297 = arith.addf %295, %296 : vector<2x8xf32>
    %298 = vector.shape_cast %297 : vector<2x8xf32> to vector<2x1x8xf32>
    %299 = vector.broadcast %298 : vector<2x1x8xf32> to vector<2x16x8xf32>
    %300 = arith.addf %299, %68 : vector<2x16x8xf32>
    %cst_96 = arith.constant 0.000000e+00 : f32
    %301 = vector.broadcast %cst_96 : f32 to vector<2x16x8xf32>
    %302 = arith.maximumf %300, %301 : vector<2x16x8xf32>
    %303 = vector.shape_cast %9 : vector<1x8xf32> to vector<1x1x8xf32>
    %304 = vector.broadcast %303 : vector<1x1x8xf32> to vector<2x16x8xf32>
    %305 = arith.mulf %302, %304 : vector<2x16x8xf32>
    %cst_97 = arith.constant dense<0.000000e+00> : vector<2x16xf32>
    %306 = vector.multi_reduction <add>, %305, %cst_97 [2] : vector<2x16x8xf32> to vector<2x16xf32>
    %307 = vector.broadcast %10 : vector<1x1xf32> to vector<2x16xf32>
    %308 = arith.addf %306, %307 : vector<2x16xf32>
    %cst_98 = arith.constant dense<0xFF800000> : vector<2xf32>
    %309 = vector.multi_reduction <maximumf>, %308, %cst_98 [1] : vector<2x16xf32> to vector<2xf32>
    %310 = vector.shape_cast %309 : vector<2xf32> to vector<2x1xf32>
    %311 = vector.broadcast %310 : vector<2x1xf32> to vector<2x16xf32>
    %312 = arith.subf %308, %311 : vector<2x16xf32>
    %313 = math.exp %312 : vector<2x16xf32>
    %cst_99 = arith.constant dense<0.000000e+00> : vector<2xf32>
    %314 = vector.multi_reduction <add>, %313, %cst_99 [1] : vector<2x16xf32> to vector<2xf32>
    %315 = vector.shape_cast %314 : vector<2xf32> to vector<2x1xf32>
    %316 = tpu.reciprocal %315 {approx = true} : vector<2x1xf32> -> vector<2x1xf32>
    %317 = vector.broadcast %316 : vector<2x1xf32> to vector<2x16xf32>
    %318 = arith.mulf %313, %317 : vector<2x16xf32>
    %319 = vector.shape_cast %318 : vector<2x16xf32> to vector<2x1x16xf32>
    %320 = vector.broadcast %319 : vector<2x1x16xf32> to vector<2x8x16xf32>
    %321 = arith.mulf %53, %320 : vector<2x8x16xf32>
    %cst_100 = arith.constant dense<0.000000e+00> : vector<2x8xf32>
    %322 = vector.multi_reduction <add>, %321, %cst_100 [2] : vector<2x8x16xf32> to vector<2x8xf32>
    %323 = tpu.concatenate %294, %322, %285 in 1 : vector<2x16xf32>, vector<2x8xf32>, vector<2x32xf32> -> vector<2x56xf32>
    %cst_101 = arith.constant dense<0.000000e+00> : vector<2x128xf32>
    %324 = tpu.matmul %323, %11, %cst_101 {dimension_numbers = #tpu.dot_dimension_numbers<[1], [0], [0], [1], [0, 0, 1, 1], [], []>} : vector<2x56xf32>, vector<56x128xf32>, vector<2x128xf32> -> vector<2x128xf32>
    %325 = vector.broadcast %12 : vector<1x128xf32> to vector<2x128xf32>
    %326 = arith.addf %324, %325 : vector<2x128xf32>
    %327 = arith.negf %326 : vector<2x128xf32>
    %328 = math.exp %327 : vector<2x128xf32>
    %cst_102 = arith.constant 1.000000e+00 : f32
    %329 = vector.broadcast %cst_102 : f32 to vector<2x128xf32>
    %330 = arith.addf %329, %328 : vector<2x128xf32>
    %331 = arith.divf %329, %330 : vector<2x128xf32>
    %332 = math.tanh %326 : vector<2x128xf32>
    %333 = vector.extract_strided_slice %331 {offsets = [0, 0], sizes = [2, 32], strides = [1, 1]} : vector<2x128xf32> to vector<2x32xf32>
    %334 = vector.extract_strided_slice %331 {offsets = [0, 32], sizes = [2, 32], strides = [1, 1]} : vector<2x128xf32> to vector<2x32xf32>
    %335 = vector.extract_strided_slice %332 {offsets = [0, 64], sizes = [2, 32], strides = [1, 1]} : vector<2x128xf32> to vector<2x32xf32>
    %336 = vector.extract_strided_slice %331 {offsets = [0, 96], sizes = [2, 32], strides = [1, 1]} : vector<2x128xf32> to vector<2x32xf32>
    %337 = arith.mulf %334, %283 : vector<2x32xf32>
    %338 = arith.mulf %333, %335 : vector<2x32xf32>
    %339 = arith.addf %337, %338 : vector<2x32xf32>
    %340 = math.tanh %339 : vector<2x32xf32>
    %341 = arith.mulf %336, %340 : vector<2x32xf32>
    %cst_103 = arith.constant dense<0.000000e+00> : vector<2x16xf32>
    %342 = tpu.matmul %341, %13, %cst_103 {dimension_numbers = #tpu.dot_dimension_numbers<[1], [0], [0], [1], [0, 0, 1, 1], [], []>} : vector<2x32xf32>, vector<32x16xf32>, vector<2x16xf32> -> vector<2x16xf32>
    %343 = vector.broadcast %14 : vector<1x16xf32> to vector<2x16xf32>
    %344 = arith.addf %342, %343 : vector<2x16xf32>
    %345 = math.tanh %344 : vector<2x16xf32>
    %cst_104 = arith.constant dense<0.000000e+00> : vector<2x128xf32>
    %346 = tpu.matmul %345, %15, %cst_104 {dimension_numbers = #tpu.dot_dimension_numbers<[1], [0], [0], [1], [0, 0, 1, 1], [], []>} : vector<2x16xf32>, vector<16x128xf32>, vector<2x128xf32> -> vector<2x128xf32>
    %347 = vector.broadcast %16 : vector<1x128xf32> to vector<2x128xf32>
    %348 = arith.addf %346, %347 : vector<2x128xf32>
    %c5 = arith.constant 5 : index
    %c0_105 = arith.constant 0 : index
    %c0_106 = arith.constant 0 : index
    %349 = vector.load %arg1[%c5, %c0_105, %c0_106] : memref<6x2x16xf32, #tpu.memory_space<vmem>>, vector<1x2x16xf32>
    %350 = vector.shape_cast %349 : vector<1x2x16xf32> to vector<2x16xf32>
    %cst_107 = arith.constant dense<0.000000e+00> : vector<2x8xf32>
    %351 = tpu.matmul %341, %7, %cst_107 {dimension_numbers = #tpu.dot_dimension_numbers<[1], [0], [0], [1], [0, 0, 1, 1], [], []>} : vector<2x32xf32>, vector<32x8xf32>, vector<2x8xf32> -> vector<2x8xf32>
    %352 = vector.broadcast %8 : vector<1x8xf32> to vector<2x8xf32>
    %353 = arith.addf %351, %352 : vector<2x8xf32>
    %354 = vector.shape_cast %353 : vector<2x8xf32> to vector<2x1x8xf32>
    %355 = vector.broadcast %354 : vector<2x1x8xf32> to vector<2x16x8xf32>
    %356 = arith.addf %355, %68 : vector<2x16x8xf32>
    %cst_108 = arith.constant 0.000000e+00 : f32
    %357 = vector.broadcast %cst_108 : f32 to vector<2x16x8xf32>
    %358 = arith.maximumf %356, %357 : vector<2x16x8xf32>
    %359 = vector.shape_cast %9 : vector<1x8xf32> to vector<1x1x8xf32>
    %360 = vector.broadcast %359 : vector<1x1x8xf32> to vector<2x16x8xf32>
    %361 = arith.mulf %358, %360 : vector<2x16x8xf32>
    %cst_109 = arith.constant dense<0.000000e+00> : vector<2x16xf32>
    %362 = vector.multi_reduction <add>, %361, %cst_109 [2] : vector<2x16x8xf32> to vector<2x16xf32>
    %363 = vector.broadcast %10 : vector<1x1xf32> to vector<2x16xf32>
    %364 = arith.addf %362, %363 : vector<2x16xf32>
    %cst_110 = arith.constant dense<0xFF800000> : vector<2xf32>
    %365 = vector.multi_reduction <maximumf>, %364, %cst_110 [1] : vector<2x16xf32> to vector<2xf32>
    %366 = vector.shape_cast %365 : vector<2xf32> to vector<2x1xf32>
    %367 = vector.broadcast %366 : vector<2x1xf32> to vector<2x16xf32>
    %368 = arith.subf %364, %367 : vector<2x16xf32>
    %369 = math.exp %368 : vector<2x16xf32>
    %cst_111 = arith.constant dense<0.000000e+00> : vector<2xf32>
    %370 = vector.multi_reduction <add>, %369, %cst_111 [1] : vector<2x16xf32> to vector<2xf32>
    %371 = vector.shape_cast %370 : vector<2xf32> to vector<2x1xf32>
    %372 = tpu.reciprocal %371 {approx = true} : vector<2x1xf32> -> vector<2x1xf32>
    %373 = vector.broadcast %372 : vector<2x1xf32> to vector<2x16xf32>
    %374 = arith.mulf %369, %373 : vector<2x16xf32>
    %375 = vector.shape_cast %374 : vector<2x16xf32> to vector<2x1x16xf32>
    %376 = vector.broadcast %375 : vector<2x1x16xf32> to vector<2x8x16xf32>
    %377 = arith.mulf %53, %376 : vector<2x8x16xf32>
    %cst_112 = arith.constant dense<0.000000e+00> : vector<2x8xf32>
    %378 = vector.multi_reduction <add>, %377, %cst_112 [2] : vector<2x8x16xf32> to vector<2x8xf32>
    %379 = tpu.concatenate %350, %378, %341 in 1 : vector<2x16xf32>, vector<2x8xf32>, vector<2x32xf32> -> vector<2x56xf32>
    %cst_113 = arith.constant dense<0.000000e+00> : vector<2x128xf32>
    %380 = tpu.matmul %379, %11, %cst_113 {dimension_numbers = #tpu.dot_dimension_numbers<[1], [0], [0], [1], [0, 0, 1, 1], [], []>} : vector<2x56xf32>, vector<56x128xf32>, vector<2x128xf32> -> vector<2x128xf32>
    %381 = vector.broadcast %12 : vector<1x128xf32> to vector<2x128xf32>
    %382 = arith.addf %380, %381 : vector<2x128xf32>
    %383 = arith.negf %382 : vector<2x128xf32>
    %384 = math.exp %383 : vector<2x128xf32>
    %cst_114 = arith.constant 1.000000e+00 : f32
    %385 = vector.broadcast %cst_114 : f32 to vector<2x128xf32>
    %386 = arith.addf %385, %384 : vector<2x128xf32>
    %387 = arith.divf %385, %386 : vector<2x128xf32>
    %388 = math.tanh %382 : vector<2x128xf32>
    %389 = vector.extract_strided_slice %387 {offsets = [0, 0], sizes = [2, 32], strides = [1, 1]} : vector<2x128xf32> to vector<2x32xf32>
    %390 = vector.extract_strided_slice %387 {offsets = [0, 32], sizes = [2, 32], strides = [1, 1]} : vector<2x128xf32> to vector<2x32xf32>
    %391 = vector.extract_strided_slice %388 {offsets = [0, 64], sizes = [2, 32], strides = [1, 1]} : vector<2x128xf32> to vector<2x32xf32>
    %392 = vector.extract_strided_slice %387 {offsets = [0, 96], sizes = [2, 32], strides = [1, 1]} : vector<2x128xf32> to vector<2x32xf32>
    %393 = arith.mulf %390, %339 : vector<2x32xf32>
    %394 = arith.mulf %389, %391 : vector<2x32xf32>
    %395 = arith.addf %393, %394 : vector<2x32xf32>
    %396 = math.tanh %395 : vector<2x32xf32>
    %397 = arith.mulf %392, %396 : vector<2x32xf32>
    %cst_115 = arith.constant dense<0.000000e+00> : vector<2x16xf32>
    %398 = tpu.matmul %397, %13, %cst_115 {dimension_numbers = #tpu.dot_dimension_numbers<[1], [0], [0], [1], [0, 0, 1, 1], [], []>} : vector<2x32xf32>, vector<32x16xf32>, vector<2x16xf32> -> vector<2x16xf32>
    %399 = vector.broadcast %14 : vector<1x16xf32> to vector<2x16xf32>
    %400 = arith.addf %398, %399 : vector<2x16xf32>
    %401 = math.tanh %400 : vector<2x16xf32>
    %cst_116 = arith.constant dense<0.000000e+00> : vector<2x128xf32>
    %402 = tpu.matmul %401, %15, %cst_116 {dimension_numbers = #tpu.dot_dimension_numbers<[1], [0], [0], [1], [0, 0, 1, 1], [], []>} : vector<2x16xf32>, vector<16x128xf32>, vector<2x128xf32> -> vector<2x128xf32>
    %403 = vector.broadcast %16 : vector<1x128xf32> to vector<2x128xf32>
    %404 = arith.addf %402, %403 : vector<2x128xf32>
    %405 = vector.shape_cast %124 : vector<2x128xf32> to vector<1x2x128xf32>
    %406 = vector.shape_cast %180 : vector<2x128xf32> to vector<1x2x128xf32>
    %407 = vector.shape_cast %236 : vector<2x128xf32> to vector<1x2x128xf32>
    %408 = vector.shape_cast %292 : vector<2x128xf32> to vector<1x2x128xf32>
    %409 = vector.shape_cast %348 : vector<2x128xf32> to vector<1x2x128xf32>
    %410 = vector.shape_cast %404 : vector<2x128xf32> to vector<1x2x128xf32>
    %411 = tpu.concatenate %405, %406, %407, %408, %409, %410 in 0 : vector<1x2x128xf32>, vector<1x2x128xf32>, vector<1x2x128xf32>, vector<1x2x128xf32>, vector<1x2x128xf32>, vector<1x2x128xf32> -> vector<6x2x128xf32>
    %c0_117 = arith.constant 0 : index
    %c0_118 = arith.constant 0 : index
    %c0_119 = arith.constant 0 : index
    %412 = vector.load %arg18[%c0_117, %c0_118, %c0_119] : memref<6x2x128xf32, #tpu.memory_space<vmem>>, vector<6x2x128xf32>
    tpu.vector_store %arg18[%c0_117, %c0_118, %c0_119], %411 {strides = array<i32>} : memref<6x2x128xf32, #tpu.memory_space<vmem>>, vector<6x2x128xf32>,
    %413 = vector.shape_cast %94 : vector<2x16xf32> to vector<1x2x16xf32>
    %414 = vector.shape_cast %150 : vector<2x16xf32> to vector<1x2x16xf32>
    %415 = vector.shape_cast %206 : vector<2x16xf32> to vector<1x2x16xf32>
    %416 = vector.shape_cast %262 : vector<2x16xf32> to vector<1x2x16xf32>
    %417 = vector.shape_cast %318 : vector<2x16xf32> to vector<1x2x16xf32>
    %418 = vector.shape_cast %374 : vector<2x16xf32> to vector<1x2x16xf32>
    %419 = tpu.concatenate %413, %414, %415, %416, %417, %418 in 0 : vector<1x2x16xf32>, vector<1x2x16xf32>, vector<1x2x16xf32>, vector<1x2x16xf32>, vector<1x2x16xf32>, vector<1x2x16xf32> -> vector<6x2x16xf32>
    %c0_120 = arith.constant 0 : index
    %c0_121 = arith.constant 0 : index
    %c0_122 = arith.constant 0 : index
    %420 = vector.load %arg19[%c0_120, %c0_121, %c0_122] : memref<6x2x16xf32, #tpu.memory_space<vmem>>, vector<6x2x16xf32>
    tpu.vector_store %arg19[%c0_120, %c0_121, %c0_122], %419 {strides = array<i32>} : memref<6x2x16xf32, #tpu.memory_space<vmem>>, vector<6x2x16xf32>,
    return
  }
}

</mosaic_0001>

<bundles_post_ra>
// kernel: tpu_custom_call.1
= control target key start
LH: loop header
LB: loop body
LE: loop exit
PB: predicated region body
PF: predicated region fallthrough
CT: control target
= control target key end

     0   :  { %s5849_s0 = inlined_call_operand.vmem [shape: f32[2,8,16], index: 0, kind: input, shape index: {}]   ;;  %s5850_s1 = inlined_call_operand.hbm [shape: f32[6,2,16], index: 1, kind: input, shape index: {}]   ;;  %s5851_s2 = inlined_call_operand.vmem [shape: f32[1,8], index: 2, kind: input, shape index: {}]   ;;  %s5852_s3 = inlined_call_operand.vmem [shape: f32[1,8], index: 3, kind: input, shape index: {}]   ;;  %s5853_s4 = inlined_call_operand.hbm [shape: f32[8,32], index: 4, kind: input, shape index: {}]   ;;  %s5854_s5 = inlined_call_operand.hbm [shape: f32[1,32], index: 5, kind: input, shape index: {}]   ;;  %s5855_s6 = inlined_call_operand.hbm [shape: f32[8,8], index: 6, kind: input, shape index: {}]   ;;  %s5856_s7 = inlined_call_operand.vmem [shape: f32[1,8], index: 7, kind: input, shape index: {}]   ;;  %s5857_s8 = inlined_call_operand.vmem [shape: f32[32,8], index: 8, kind: input, shape index: {}]   ;;  %s5858_s9 = inlined_call_operand.vmem [shape: f32[1,8], index: 9, kind: input, shape index: {}]   ;;  %s5859_s10 = inlined_call_operand.vmem [shape: f32[1,8], index: 10, kind: input, shape index: {}]   ;;  %s5860_s11 = inlined_call_operand.<no memory space> [shape: f32[1,1], index: 11, kind: input, shape index: {}]   ;;  %s5861_s12 = inlined_call_operand.vmem [shape: f32[56,128], index: 12, kind: input, shape index: {}]   ;;  %s5862_s13 = inlined_call_operand.vmem [shape: f32[1,128], index: 13, kind: input, shape index: {}]   ;;  %s5863_s14 = inlined_call_operand.vmem [shape: f32[32,16], index: 14, kind: input, shape index: {}]   ;;  %s5864_s15 = inlined_call_operand.vmem [shape: f32[1,16], index: 15, kind: input, shape index: {}]   ;;  %s5865_s16 = inlined_call_operand.vmem [shape: f32[16,128], index: 16, kind: input, shape index: {}]   ;;  %s5866_s17 = inlined_call_operand.vmem [shape: f32[1,128], index: 17, kind: input, shape index: {}]   ;;  %s5867_s18 = inlined_call_operand.hbm [shape: f32[6,2,128], index: 18, kind: output, shape index: {0}]   ;;  %s5868_s19 = inlined_call_operand.hbm [shape: f32[6,2,16], index: 19, kind: output, shape index: {1}]  }
   0x1   :  { %5871 = sst [smem:[#allocation19_spill]] %s5849_s0  ;;  %v25_v0 = vstv %s5860_s11 }
   0x2   :  { %5872 = sst [smem:[#allocation20_spill]] %s5850_s1  ;;  %26 = vst [vmem:[#allocation2] sm:$0x1] %v25_v0 }
   0x3   :  { %5873 = sst [smem:[#allocation21_spill]] %s5851_s2 }
   0x4   :  { %5874 = sst [smem:[#allocation22_spill]] %s5852_s3 }
   0x5   :  { %27 = vsyncpa [#allocation4], 0 }
   0x6   :  { %28 = vsyncpa [#allocation7], 0 }
   0x7   :  { %29 = vsyncpa [#allocation10], 0 }
   0x8   :  { %30 = vsyncpa [#allocation5], 0 }
   0x9   :  { %31 = vsyncpa [#allocation13], 0  ;;  %s4820_s20 = smov [#allocation6]   ;;  %s4821_s1 = smov [#allocation3]  }
   0xa   :  { %s56_s21 = sshll.u32 %s4820_s20, 4  ;;  %s39_s22 = sshll.u32 %s4821_s1, 4  ;;  %s57_s21 = int_to_ptr.vmem [resolvable:$true] %s56_s21  ;;  %s4939_s22 = int_to_ptr.vmem [resolvable:$true] %s39_s22 }
   0xb   :  { %s4678_s24 = scalar_lea.hbm %s5853_s4, 128 }
   0xc   :  { %p4679_p0 = scmp.ne.s32.totalorder %s5853_s4, %s4678_s24  ;;  %p4682_p1 = scmp.lt.u32.totalorder %s4678_s24, %s5853_s4 }
   0xe   :  { %p4684_p2 = pnand %p4682_p1, %p4679_p0 }
  0x10   :  { %4687 = shalt.err (!%p4684_p2)
}
  0x11   :  { %s4688_s27 = scalar_lea.vmem %s57_s21, 128  ;;  %p4693_p4 = scmp.lt.s32.totalorder %s57_s21, %s57_s21 }
  0x12   :  { %p4689_p3 = scmp.ne.s32.totalorder %s57_s21, %s4688_s27  ;;  %p4694_p5 = scmp.lt.s32.totalorder %s4688_s27, %s4688_s27 }
  0x14   :  { %p4695_p6 = por %p4694_p5, %p4693_p4 }
  0x16   :  { %p4696_p7 = pnand %p4695_p6, %p4689_p3 }
  0x18   :  { %4699 = shalt.err (!%p4696_p7)
}
  0x19   :  { %59 = dma.hbm_to_vmem [thread:$0]  %s5853_s4, 128, %s57_s21, [#allocation7]  }
  0x1a   :  { %s5875_s20 = sld [smem:[#allocation20_spill]] }
  0x20   :  { %s4700_s1 = scalar_lea.hbm %s5875_s20, 192 }
  0x21   :  { %p4701_p8 = scmp.ne.s32.totalorder %s5875_s20, %s4700_s1  ;;  %p4704_p9 = scmp.lt.u32.totalorder %s4700_s1, %s5875_s20 }
  0x23   :  { %p4706_p10 = pnand %p4704_p9, %p4701_p8 }
  0x25   :  { %4709 = shalt.err (!%p4706_p10)
}
  0x26   :  { %s4710_s3 = scalar_lea.vmem %s4939_s22, 192  ;;  %p4715_p12 = scmp.lt.s32.totalorder %s4939_s22, %s4939_s22 }
  0x27   :  { %p4711_p11 = scmp.ne.s32.totalorder %s4939_s22, %s4710_s3  ;;  %p4716_p13 = scmp.lt.s32.totalorder %s4710_s3, %s4710_s3 }
  0x29   :  { %p4717_p0 = por %p4716_p13, %p4715_p12 }
  0x2b   :  { %p4718_p1 = pnand %p4717_p0, %p4711_p11 }
  0x2d   :  { %4721 = shalt.err (!%p4718_p1)
}
  0x2e   :  { %s4822_s4 = smov 32   ;;  %s4823_s21 = smov 2  }
  0x2f   :  { %45 = dma.hbm_to_vmem [thread:$0]  %s5875_s20, 192, %s4939_s22, [#allocation4], %s4822_s4, %s4822_s4, %s4823_s21  }
  0x30   :  { %s4824_s27 = smov [#allocation8]   ;;  %s4825_s29 = smov [#allocation9]  }
  0x31   :  { %s66_s28 = sshll.u32 %s4824_s27, 4  ;;  %s76_s0 = sshll.u32 %s4825_s29, 4  ;;  %s67_s28 = int_to_ptr.vmem [resolvable:$true] %s66_s28  ;;  %s77_s0 = int_to_ptr.vmem [resolvable:$true] %s76_s0 }
  0x32   :  { %s4722_s2 = scalar_lea.hbm %s5854_s5, 16 }
  0x33   :  { %p4723_p2 = scmp.ne.s32.totalorder %s5854_s5, %s4722_s2  ;;  %p4726_p3 = scmp.lt.u32.totalorder %s4722_s2, %s5854_s5 }
  0x35   :  { %p4728_p4 = pnand %p4726_p3, %p4723_p2 }
  0x37   :  { %4731 = shalt.err (!%p4728_p4)
}
  0x38   :  { %s4732_s22 = scalar_lea.vmem %s67_s28, 16  ;;  %s4736_s20 = scalar_lea.vmem %s67_s28, 32 }
  0x39   :  { %p4733_p5 = scmp.ne.s32.totalorder %s67_s28, %s4732_s22  ;;  %p4737_p6 = scmp.lt.s32.totalorder %s67_s28, %s67_s28 }
  0x3a   :  { %p4738_p7 = scmp.lt.s32.totalorder %s4736_s20, %s4732_s22 }
  0x3c   :  { %p4739_p8 = por %p4738_p7, %p4737_p6 }
  0x3e   :  { %p4740_p9 = pnand %p4739_p8, %p4733_p5 }
  0x40   :  { %4743 = shalt.err (!%p4740_p9)
}
  0x41   :  { %69 = dma.hbm_to_vmem [thread:$0]  %s5854_s5, 16, %s67_s28, [#allocation7]  }
  0x42   :  { %s4744_s30 = scalar_lea.hbm %s5855_s6, 128 }
  0x43   :  { %p4745_p10 = scmp.ne.s32.totalorder %s5855_s6, %s4744_s30  ;;  %p4748_p11 = scmp.lt.u32.totalorder %s4744_s30, %s5855_s6 }
  0x45   :  { %p4750_p12 = pnand %p4748_p11, %p4745_p10 }
  0x47   :  { %4753 = shalt.err (!%p4750_p12)
}
  0x48   :  { %s4754_s25 = scalar_lea.vmem %s77_s0, 128  ;;  %p4759_p0 = scmp.lt.s32.totalorder %s77_s0, %s77_s0 }
  0x49   :  { %p4755_p13 = scmp.ne.s32.totalorder %s77_s0, %s4754_s25  ;;  %p4760_p1 = scmp.lt.s32.totalorder %s4754_s25, %s4754_s25 }
  0x4b   :  { %p4761_p2 = por %p4760_p1, %p4759_p0 }
  0x4d   :  { %p4762_p3 = pnand %p4761_p2, %p4755_p13 }
  0x4f   :  { %4765 = shalt.err (!%p4762_p3)
}
  0x50   :  { %79 = dma.hbm_to_vmem [thread:$0]  %s5855_s6, 128, %s77_s0, [#allocation10]  }
  0x51   :  { %4810 = dma.done.wait [#allocation4], 192  }
  0x52   :  { %4811 = vsyncadd [#allocation4], 4294967104 }
  0x53   :  { %4812 = dma.done.wait [#allocation7], 144  }
  0x54   :  { %4813 = vsyncadd [#allocation7], 4294967152 }
  0x55   :  { %4814 = dma.done.wait [#allocation10], 128  }
  0x56   :  { %4815 = vsyncadd [#allocation10], 4294967168  ;;  %vm145_vm0 = vcmask 130048   ;;  %s5876_s20 = sld [smem:[#allocation19_spill]]  ;;  %s5877_s27 = sld [smem:[#allocation22_spill]]  ;;  %v4826_v10 = vmov 0.0   ;;  %v163_v13 = vlaneseq }
  0x57   :  { %4097 = vmatprep.subr.mxu0 %v4826_v10  ;;  %v118_v11 = vld [vmem:[#allocation6] sm:$0xff]  ;;  %vm4827_vm1 = vmmov 0   ;;  %s5878_s1 = sld [smem:[#allocation21_spill]]  ;;  %vm173_vm2 = vcmask 1041409   ;;  %vm175_vm3 = vcmask 64512   ;;  %v122_v46 = vld [vmem:[%s5857_s8] sm:$0xff] }
  0x58   :  { %4098 = vmatpush3.msra.mxu0 %v118_v11  ;;  %4099 = vmatprep.mubr.msk.f32.mxu0 %vm4827_vm1, %v4826_v10  ;;  %v5016_v14 = vand.u32 127, %v163_v13  ;;  %v5018_v15 = vshrl.u32 %v163_v13, 7  ;;  %v123_v47 = vld [vmem:[%s5857_s8 + $0x8] sm:$0xff]  ;;  %v124_v48 = vld [vmem:[%s5857_s8 + $0x10] sm:$0xff]  ;;  %v4828_v49 = vmov 0.0|0.0   ;;  %v125_v51 = vld [vmem:[%s5857_s8 + $0x18] sm:$0xff] }
  0x59   :  { %4386 = vmatprep.subr.bf16.mxu0 %v4828_v49  ;;  %v5046_v50 = vpack.c.bf16 %v123_v47, %v122_v46  ;;  %v5052_v52 = vpack.c.bf16 %v125_v51, %v124_v48  ;;  %v120_v53 = vld [vmem:[#allocation9] sm:$0xff]  ;;  %v3919_v58 = vld [vmem:[#allocation8] ss:$0 sm:$0xff]  ;;  %vm468_vm4 = vcmask 261120   ;;  %v4829_v63 = vmov 0   ;;  %s4833_s8 = smov 56  }
  0x5a   :  { %v5022_v18 = vsub.s32 %v5016_v14, %v5018_v15  ;;  %4102 = vmatprep.subr.mxu1 %v120_v53  ;;  %v3927_v13 = vld [vmem:[%s5856_s7] ss:$0 sm:$0xff]  ;;  %vm631_vm5 = vcmask 130112   ;;  %vm644_vm6 = vcmask 123904   ;;  %vm805_vm7 = vcmask 195584   ;;  %s4832_s7 = smov 64  }
  0x5b   :  { %4103 = vmatpush3.msra.mxu1 %v120_v53  ;;  %v3931_v47 = vld [vmem:[#allocation2] ss:$0 sm:$0xff]  ;;  %v626_v53 = vadd.s32 4294967288, %v5016_v14  ;;  %vm813_vm8 = vcmask 457728  }
  0x5c   :  { %v114_v1 = vld [vmem:[%s5876_s20] sm:$0xff]  ;;  %v115_v2 = vld [vmem:[%s5876_s20 + $0x8] sm:$0xff]  ;;  %4392 = vmatprep.subr.bf16.mxu1 %v4828_v49  ;;  %s4831_s20 = smov 24  }
  0x5d   :  { %v146_v3 = vsel %vm145_vm0, %v114_v1, 0.0  ;;  %v252_v4 = vmul.f32 %v114_v1, %v114_v1  ;;  %v253_v5 = vmul.f32 %v115_v2, %v115_v2  ;;  %v149_v7 = vsel %vm145_vm0, %v115_v2, 0.0  ;;  %v3922_v9 = vld [vmem:[%s5877_s27] ss:$0 sm:$0xff] }
  0x5e   :  { %147 = vadd.xlane.f32.xlu0 %v146_v3  ;;  %v3921_v12 = vld [vmem:[%s5878_s1] ss:$0 sm:$0xff] }
  0x5f   :  { %v254_v6 = vsel %vm145_vm0, %v252_v4, 0.0  ;;  %v257_v8 = vsel %vm145_vm0, %v253_v5, 0.0  ;;  %v4830_v4 = vmov 1966171168  }
  0x60   :  { %255 = vadd.xlane.f32.xlu1 %v254_v6  ;;  %v544_v5 = vunpack.c.l.s4 %v4830_v4 }
  0x62   :  { %150 = vadd.xlane.f32.xlu0 %v149_v7  ;;  %v545_v6 = vunpack.c.0.s8 %v544_v5  ;;  %v5073_v7 = vld [vmem:[%s5858_s9] ss:$0 sm:$0xff] }
  0x64   :  { %258 = vadd.xlane.f32.xlu1 %v257_v8  ;;  %v5076_v8 = vsub.s32 %v545_v6, %v5018_v15 }
  0x75   :  { %286 = vbcast.lane.b32.xlu1 %v3922_v9, 256 }
  0x78   :  { %277 = vbcast.lane.b32.xlu0 %v3921_v12, 256 }
  0xeb   :  { %v148_v16 = vpop.xlane.xlu0 %147 }
  0xec   :  { %v153_v19 = vmul.f32 0.0625, %v148_v16 }
  0xed   :  { %v256_v17 = vpop.xlane.xlu1 %255 }
  0xee   :  { %v260_v21 = vmul.f32 0.0625, %v256_v17  ;;  %v168_v24 = vrot.slane %v153_v19, %v5022_v18  ;;  %v5084_v17 = vsub.s32 0, %v5018_v15 }
  0xef   :  { %v151_v20 = vpop.xlane.xlu0 %150 }
  0xf0   :  { %v154_v22 = vmul.f32 0.0625, %v151_v20 }
  0xf1   :  { %v259_v23 = vpop.xlane.xlu1 %258 }
  0xf2   :  { %v172_v25 = vrot.slane %v154_v22, %v5022_v18  ;;  %v249_v26 = vadd.f32 %v154_v22, %v153_v19  ;;  %v261_v27 = vmul.f32 0.0625, %v259_v23 }
  0xf3   :  { %v278_v38 = vpop.permute.xlu0 %277 }
  0xf4   :  { %v251_v28 = vmul.f32 0.5, %v249_v26  ;;  %v262_v29 = vadd.f32 %v261_v27, %v260_v21  ;;  %v174_v30 = vsel %vm173_vm2, %v172_v25, %v168_v24 }
  0xf5   :  { %4100 = vmatmul.mubr.msk.f32.vlgmr.msra.gmra.mrb[0].mxu0 %vm175_vm3, %v174_v30  ;;  %v287_v41 = vpop.permute.xlu1 %286  ;;  %v5103_v30 = vld [vmem:[%s5859_s10] ss:$0 sm:$0xff] }
  0xf6   :  { %v263_v31 = vmul.f32 0.5, %v262_v29  ;;  %v264_v32 = vmul.f32 %v251_v28, %v251_v28  ;;  %4118 = vmatprep.mubr.msk.f32.mxu0 %vm4827_vm1, %v4826_v10  ;;  %v268_v35 = vsub.f32 %v114_v1, %v251_v28  ;;  %v269_v36 = vsub.f32 %v115_v2, %v251_v28  ;;  %4388 = vmatpush3.bf16.msra.mxu0 %v5046_v50 }
  0xf7   :  { %4389 = vmatprep.subr.bf16.mxu0 %v4828_v49 }
  0xf8   :  { %v265_v33 = vsub.f32 %v263_v31, %v264_v32 }
  0xfa   :  { %v266_v34 = vadd.f32 1e-05, %v265_v33  ;;  %4391 = vmatpush3.bf16.msra.mxu0 %v5052_v52 }
  0xfb   :  { %4401 = vmatprep.subr.bf16.mxu0 %v4828_v49 }
  0xfc   :  { %4548 = vrsqrt.f32 %v266_v34 }
 0x106   :  { %v4549_v37 = vpop.eup %4548 }
 0x107   :  { %v270_v39 = vmul.f32 %v4549_v37, %v268_v35  ;;  %v271_v40 = vmul.f32 %v4549_v37, %v269_v36 }
 0x109   :  { %v279_v42 = vmul.f32 %v278_v38, %v270_v39  ;;  %v280_v43 = vmul.f32 %v278_v38, %v271_v40 }
 0x10b   :  { %v5030_v44 = vadd.f32 %v287_v41, %v279_v42  ;;  %v5032_v45 = vadd.f32 %v287_v41, %v280_v43 }
 0x10d   :  { %322 = vxpose.xlu0.b32.start.end [1/1] (short) (narrow) %v5032_v45, 16  ;;  %290 = vxpose.xlu1.b32.start.end [1/1] (short) (narrow) %v5030_v44, 16 }
 0x12b   :  { %4547 = vset.pattern.permute.xlu1 %v4829_v63 }
 0x136   :  { %4546 = vset.pattern.permute.xlu0 %v4829_v63 }
 0x18d   :  { %v306_v54 = vpop.trf.xlu1  ;;  %v338_v55 = vpop.trf.xlu0 }
 0x18e   :  { %4104 = vmatprep.mubr.msk.f32.mxu1 %vm175_vm3, %v306_v54 }
 0x191   :  { %v307_v56 = vpop.trf.xlu1  ;;  %v339_v57 = vpop.trf.xlu0 }
 0x192   :  { %4105 = vmatmul.mubr.msk.f32.vlgmr.msra.gmra.mrb[0].mxu1 %vm175_vm3, %v307_v56 }
 0x193   :  { %4107 = vmatprep.mubr.msk.f32.mxu1 %vm175_vm3, %v338_v55  ;;  %v5117_v55 = vsub.s32 %v626_v53, %v5018_v15 }
 0x196   :  { %4108 = vmatmul.mubr.msk.f32.gmra.mrb[2].mxu1 %vm175_vm3, %v339_v57 }
 0x197   :  { %4135 = vmatprep.mubr.msk.f32.mxu1 %vm4827_vm1, %v4826_v10 }
 0x1c8   :  { %v244_v59 = vpop.f32.mrb[0].mxu0 }
 0x1c9   :  { %v245_v60 = vadd.f32 %v3919_v58, %v244_v59  ;;  %v4101_v61 = vpop.f32.mrb[1].mxu0 }
 0x1cb   :  { %4550 = vtanh.f32 %v245_v60 }
 0x1d5   :  { %v5064_v62 = vpop.eup %4550 }
 0x1d6   :  { %4119 = vmatmul.mubr.msk.f32.vlgmr.msra.gmra.mrb[2].mxu0 %vm468_vm4, %v5064_v62 }
 0x1d7   :  { %4146 = vmatprep.mubr.msk.f32.mxu0 %vm4827_vm1, %v4826_v10 }
 0x265   :  { %v4106_v0 = vpop.f32.mrb[0].mxu1 }
 0x266   :  { %v432_v1 = vpop.f32.mrb[1].mxu1  ;;  %v5087_v21 = vadd.f32 %v4106_v0, %v3927_v13 }
 0x267   :  { %v5089_v22 = vadd.f32 %v3927_v13, %v432_v1 }
 0x269   :  { %v4109_v2 = vpop.f32.mrb[2].mxu1 }
 0x26a   :  { %v442_v3 = vpop.f32.mrb[3].mxu1  ;;  %v5093_v25 = vadd.f32 %v4109_v2, %v3927_v13 }
 0x26b   :  { %v5095_v26 = vadd.f32 %v3927_v13, %v442_v3 }
 0x2a9   :  { %v538_v9 = vpop.f32.mrb[2].mxu0 }
 0x2aa   :  { %v539_v11 = vadd.f32 %v5073_v7, %v538_v9  ;;  %v4120_v12 = vpop.f32.mrb[3].mxu0  ;;  %v5134_v9 = vsub.s32 1, %v5018_v15 }
 0x2ac   :  { %v549_v16 = vrot.slane %v539_v11, %v5076_v8 }
 0x2ae   :  { %v550_v19 = vcombine.high %v549_v16, %v549_v16  ;;  %v557_v20 = vrot.slane %v549_v16, %v5076_v8 }
 0x2b0   :  { %v564_v23 = vrot.slane %v550_v19, %v5076_v8  ;;  %v568_v24 = vrot.slane %v557_v20, %v5084_v17 }
 0x2b2   :  { %v576_v27 = vadd.f32 %v568_v24, %v5087_v21  ;;  %v575_v28 = vadd.f32 %v568_v24, %v5089_v22  ;;  %v572_v29 = vrot.slane %v564_v23, %v5084_v17 }
 0x2b4   :  { %v580_v31 = vmax.f32 %v576_v27, 0.0  ;;  %v579_v32 = vmax.f32 %v575_v28, 0.0  ;;  %v578_v33 = vadd.f32 %v572_v29, %v5093_v25  ;;  %v577_v34 = vadd.f32 %v572_v29, %v5095_v26 }
 0x2b6   :  { %v590_v35 = vmul.f32 %v5103_v30, %v580_v31  ;;  %v589_v36 = vmul.f32 %v5103_v30, %v579_v32  ;;  %v582_v37 = vmax.f32 %v578_v33, 0.0  ;;  %v581_v38 = vmax.f32 %v577_v34, 0.0 }
 0x2b8   :  { %v596_v39 = vsel %vm175_vm3, %v590_v35, 0.0  ;;  %v593_v40 = vsel %vm175_vm3, %v589_v36, 0.0  ;;  %v592_v41 = vmul.f32 %v5103_v30, %v582_v37  ;;  %v591_v42 = vmul.f32 %v5103_v30, %v581_v38 }
 0x2b9   :  { %597 = vadd.xlane.f32.xlu1 %v596_v39  ;;  %594 = vadd.xlane.f32.xlu0 %v593_v40 }
 0x2ba   :  { %v602_v43 = vsel %vm175_vm3, %v592_v41, 0.0  ;;  %v599_v46 = vsel %vm175_vm3, %v591_v42, 0.0 }
 0x2bd   :  { %603 = vadd.xlane.f32.xlu1 %v602_v43  ;;  %600 = vadd.xlane.f32.xlu0 %v599_v46 }
 0x2d3   :  { %611 = vperm.xlu0 %4546, %v3931_v47  }
 0x346   :  { %v595_v48 = vpop.xlane.xlu0 %594  ;;  %v598_v51 = vpop.xlane.xlu1 %597 }
 0x34a   :  { %v601_v54 = vpop.xlane.xlu0 %600  ;;  %v604_v56 = vpop.xlane.xlu1 %603 }
 0x352   :  { %v5119_v57 = vpop.permute.xlu0 %611 }
 0x353   :  { %v614_v58 = vadd.f32 %v5119_v57, %v595_v48  ;;  %v615_v59 = vadd.f32 %v5119_v57, %v598_v51  ;;  %v616_v60 = vadd.f32 %v5119_v57, %v601_v54  ;;  %v617_v61 = vadd.f32 %v5119_v57, %v604_v56 }
 0x355   :  { %v625_v63 = vrot.slane %v614_v58, %v5022_v18  ;;  %v630_v0 = vrot.slane %v615_v59, %v5117_v55  ;;  %v636_v1 = vrot.slane %v616_v60, %v5022_v18  ;;  %v640_v2 = vrot.slane %v617_v61, %v5117_v55 }
 0x357   :  { %v632_v3 = vsel %vm631_vm5, %v630_v0, %v625_v63  ;;  %v641_v4 = vsel %vm631_vm5, %v640_v2, %v636_v1  ;;  %v129_v63 = vld [vmem:[%s5861_s12] sm:$0xff]  ;;  %v130_v0 = vld [vmem:[%s5861_s12 + $0x8] sm:$0xff] }
 0x358   :  { %v642_v5 = vsel %vm173_vm2, %v641_v4, %v632_v3  ;;  %v5154_v1 = vpack.c.bf16 %v130_v0, %v129_v63 }
 0x359   :  { %v645_v6 = vsel %vm644_vm6, %v642_v5, -inf }
 0x35a   :  { %646 = vmax.xlane.f32.xlu1 %v645_v6  ;;  %4394 = vmatpush3.bf16.msra.mxu1 %v5154_v1 }
 0x35b   :  { %4395 = vmatprep.subr.bf16.mxu1 %v4828_v49 }
 0x3e7   :  { %v647_v11 = vpop.xlane.xlu1 %646 }
 0x3e8   :  { %v652_v12 = vrot.slane %v647_v11, %v5084_v17  ;;  %v656_v13 = vrot.slane %v647_v11, %v5134_v9 }
 0x3ea   :  { %v659_v16 = vsub.f32 %v614_v58, %v652_v12  ;;  %v660_v19 = vsub.f32 %v615_v59, %v652_v12  ;;  %v661_v23 = vsub.f32 %v616_v60, %v656_v13  ;;  %v662_v27 = vsub.f32 %v617_v61, %v656_v13 }
 0x3ec   :  { %v663_v20 = vmul.f32 1.442695, %v659_v16  ;;  %v665_v24 = vmul.f32 1.442695, %v660_v19  ;;  %v667_v28 = vmul.f32 1.442695, %v661_v23 }
 0x3ed   :  { %v669_v29 = vmul.f32 1.442695, %v662_v27 }
 0x3ee   :  { %4552 = vpow2.f32 %v663_v20 }
 0x3ef   :  { %4554 = vpow2.f32 %v665_v24 }
 0x3f0   :  { %4556 = vpow2.f32 %v667_v28 }
 0x3f1   :  { %4558 = vpow2.f32 %v669_v29  ;;  %v131_v29 = vld [vmem:[%s5861_s12 + $0x10] sm:$0xff] }
 0x3f8   :  { %v4553_v31 = vpop.eup %4552 }
 0x3f9   :  { %676 = vperm.xlu1 %4547, %v4553_v31   ;;  %v4555_v32 = vpop.eup %4554 }
 0x3fa   :  { %v4557_v33 = vpop.eup %4556 }
 0x3fb   :  { %v4559_v34 = vpop.eup %4558 }
 0x3fd   :  { %679 = vperm.xlu1 %4547, %v4555_v32  }
 0x401   :  { %682 = vperm.xlu1 %4547, %v4557_v33  }
 0x405   :  { %685 = vperm.xlu1 %4547, %v4559_v34  }
 0x478   :  { %v677_v35 = vpop.permute.xlu1 %676 }
 0x479   :  { %v690_v40 = vrot.slane %v677_v35, %v5022_v18 }
 0x47c   :  { %v680_v36 = vpop.permute.xlu1 %679 }
 0x47d   :  { %v694_v38 = vrot.slane %v680_v36, %v5117_v55  ;;  %v5195_v36 = vld [vmem:[%s5861_s12 + $0x30] sm:$0xff] }
 0x47f   :  { %v695_v43 = vsel %vm631_vm5, %v694_v38, %v690_v40 }
 0x480   :  { %v683_v37 = vpop.permute.xlu1 %682 }
 0x481   :  { %v699_v41 = vrot.slane %v683_v37, %v5022_v18  ;;  %v790_v37 = vadd.s32 4294967280, %v5016_v14  ;;  %v5215_v14 = vld [vmem:[%s5862_s13] ss:$0 sm:$0xff] }
 0x483   :  { %v5202_v38 = vsub.s32 %v790_v37, %v5018_v15 }
 0x484   :  { %v686_v39 = vpop.permute.xlu1 %685 }
 0x485   :  { %v703_v42 = vrot.slane %v686_v39, %v5117_v55 }
 0x487   :  { %v704_v46 = vsel %vm631_vm5, %v703_v42, %v699_v41 }
 0x488   :  { %v705_v47 = vsel %vm173_vm2, %v704_v46, %v695_v43  ;;  %v461_v43 = vld [vmem:[#allocation3] sm:$0x3] }
 0x489   :  { %v707_v48 = vsel %vm644_vm6, %v705_v47, 0.0 }
 0x48a   :  { %708 = vadd.xlane.f32.xlu1 %v707_v48 }
 0x517   :  { %v709_v51 = vpop.xlane.xlu1 %708 }
 0x518   :  { %4560 = vrcp.f32 %v709_v51 }
 0x522   :  { %v4561_v53 = vpop.eup %4560 }
 0x523   :  { %v715_v54 = vrot.slane %v4561_v53, %v5084_v17  ;;  %v719_v59 = vrot.slane %v4561_v53, %v5134_v9 }
 0x525   :  { %v722_v56 = vmul.f32 %v4553_v31, %v715_v54  ;;  %v723_v58 = vmul.f32 %v4555_v32, %v715_v54  ;;  %v724_v60 = vmul.f32 %v4557_v33, %v719_v59  ;;  %v725_v61 = vmul.f32 %v4559_v34, %v719_v59  ;;  %v132_v31 = vld [vmem:[%s5861_s12 + $0x18] sm:$0xff]  ;;  %v133_v33 = vld [vmem:[%s5861_s12 + $0x20] sm:$0xff]  ;;  %v134_v34 = vld [vmem:[%s5861_s12 + $0x28] sm:$0xff] }
 0x526   :  { %v5176_v32 = vpack.c.bf16 %v132_v31, %v131_v29  ;;  %v5186_v35 = vpack.c.bf16 %v134_v34, %v133_v33  ;;  %v5275_v31 = vld [vmem:[%s5864_s15] ss:$0 sm:$0xff] }
 0x527   :  { %731 = vperm.xlu0 %4546, %v722_v56  }
 0x528   :  { %4397 = vmatpush3.bf16.msra.mxu1 %v5176_v32 }
 0x529   :  { %4398 = vmatprep.subr.bf16.mxu1 %v4828_v49 }
 0x52b   :  { %734 = vperm.xlu0 %4546, %v723_v58  }
 0x52c   :  { %4400 = vmatpush3.bf16.msra.mxu1 %v5186_v35 }
 0x52d   :  { %4133 = vmatprep.subr.mxu1 %v4826_v10 }
 0x52f   :  { %737 = vperm.xlu0 %4546, %v724_v60  }
 0x530   :  { %4134 = vmatpush3.msra.mxu1 %v5195_v36 }
 0x531   :  { %4407 = vmatprep.subr.bf16.mxu1 %v4828_v49 }
 0x533   :  { %740 = vperm.xlu0 %4546, %v725_v61  }
 0x5a6   :  { %v732_v2 = vpop.permute.xlu0 %731 }
 0x5a7   :  { %v745_v4 = vrot.slane %v732_v2, %v5022_v18 }
 0x5aa   :  { %v735_v3 = vpop.permute.xlu0 %734 }
 0x5ab   :  { %v749_v5 = vrot.slane %v735_v3, %v5117_v55 }
 0x5ad   :  { %v750_v6 = vsel %vm631_vm5, %v749_v5, %v745_v4  ;;  %v137_v5 = vld [vmem:[%s5863_s14] sm:$0xff] }
 0x5ae   :  { %v738_v11 = vpop.permute.xlu0 %737  ;;  %v780_v12 = vmul.f32 %v750_v6, %v5030_v44 }
 0x5af   :  { %v754_v19 = vrot.slane %v738_v11, %v5022_v18  ;;  %v139_v11 = vld [vmem:[%s5863_s14 + $0x10] sm:$0xff] }
 0x5b0   :  { %v782_v13 = vsel %vm145_vm0, %v780_v12, 0.0 }
 0x5b1   :  { %783 = vadd.xlane.f32.xlu0 %v782_v13  ;;  %v140_v13 = vld [vmem:[%s5863_s14 + $0x18] sm:$0xff] }
 0x5b2   :  { %v741_v16 = vpop.permute.xlu0 %740 }
 0x5b3   :  { %v758_v20 = vrot.slane %v741_v16, %v5117_v55  ;;  %v5238_v16 = vpack.c.bf16 %v140_v13, %v139_v11 }
 0x5b5   :  { %v759_v23 = vsel %vm631_vm5, %v758_v20, %v754_v19 }
 0x5b6   :  { %v781_v24 = vmul.f32 %v759_v23, %v5032_v45  ;;  %v3866_v27 = vsel %vm173_vm2, %v759_v23, %v750_v6  ;;  %v138_v6 = vld [vmem:[%s5863_s14 + $0x8] sm:$0xff] }
 0x5b7   :  { %3878 = vst.msk [vmem:[#allocation12] sm:$0x3] %vm644_vm6, %v3866_v27  ;;  %v5232_v12 = vpack.c.bf16 %v138_v6, %v137_v5  ;;  %v142_v27 = vld [vmem:[%s5865_s16] sm:$0xff] }
 0x5b8   :  { %v785_v28 = vsel %vm145_vm0, %v781_v24, 0.0 }
 0x5b9   :  { %786 = vadd.xlane.f32.xlu1 %v785_v28  ;;  %4403 = vmatpush3.bf16.msra.mxu0 %v5232_v12  ;;  %v143_v28 = vld [vmem:[%s5865_s16 + $0x8] sm:$0xff] }
 0x5ba   :  { %4404 = vmatprep.subr.bf16.mxu0 %v4828_v49  ;;  %v5268_v29 = vpack.c.bf16 %v143_v28, %v142_v27 }
 0x5bd   :  { %4406 = vmatpush3.bf16.msra.mxu0 %v5238_v16 }
 0x5be   :  { %4410 = vmatprep.subr.bf16.mxu0 %v4828_v49 }
 0x5c7   :  { %894 = vrot.lane.b32.xlu0 %v5064_v62, %s4822_s4 }
 0x5ca   :  { %801 = vrot.lane.b32.xlu1 %v5064_v62, %s4831_s20 }
 0x63e   :  { %v784_v39 = vpop.xlane.xlu0 %783 }
 0x63f   :  { %v794_v41 = vrot.slane %v784_v39, %v5202_v38 }
 0x642   :  { %v895_v0 = vpop.permute.xlu0 %894 }
 0x646   :  { %v787_v40 = vpop.xlane.xlu1 %786 }
 0x647   :  { %v798_v42 = vrot.slane %v787_v40, %v5202_v38 }
 0x649   :  { %v799_v46 = vsel %vm173_vm2, %v798_v42, %v794_v41 }
 0x64a   :  { %v802_v62 = vpop.permute.xlu1 %801  ;;  %v804_v47 = vsel %vm145_vm0, %v461_v43, %v799_v46 }
 0x64b   :  { %v806_v48 = vsel %vm805_vm7, %v804_v47, %v802_v62 }
 0x64c   :  { %4136 = vmatmul.mubr.msk.f32.vlgmr.msra.gmra.mrb[4].mxu1 %vm813_vm8, %v806_v48 }
 0x64d   :  { %4153 = vmatprep.mubr.msk.f32.mxu1 %vm4827_vm1, %v4826_v10  ;;  %4409 = vmatpush3.bf16.msra.mxu1 %v5268_v29 }
 0x64e   :  { %4416 = vmatprep.subr.bf16.mxu1 %v4828_v49 }
 0x71f   :  { %v883_v15 = vpop.f32.mrb[4].mxu1 }
 0x720   :  { %v884_v51 = vadd.f32 %v5215_v14, %v883_v15  ;;  %v4137_v53 = vpop.f32.mrb[5].mxu1 }
 0x722   :  { %4562 = vtanh.f32 %v884_v51  ;;  %v3934_v56 = vmul.f32 -1.442695, %v884_v51 }
 0x724   :  { %4564 = vpow2.f32 %v3934_v56 }
 0x72c   :  { %v4563_v54 = vpop.eup %4562 }
 0x72d   :  { %899 = vrot.lane.b32.xlu1 %v4563_v54, %s4832_s7 }
 0x72e   :  { %v4565_v58 = vpop.eup %4564 }
 0x72f   :  { %v890_v59 = vadd.f32 1.0, %v4565_v58 }
 0x731   :  { %4566 = vrcp.f32 %v890_v59 }
 0x73b   :  { %v4567_v60 = vpop.eup %4566 }
 0x73c   :  { %v897_v2 = vmul.f32 %v4567_v60, %v895_v0 }
 0x79f   :  { %v900_v61 = vpop.permute.xlu1 %899 }
 0x7a0   :  { %v902_v63 = vmul.f32 %v4567_v60, %v900_v61 }
 0x7a2   :  { %904 = vrot.lane.b32.xlu1 %v902_v63, %s4822_s4 }
 0x814   :  { %v905_v3 = vpop.permute.xlu1 %904 }
 0x815   :  { %v5220_v4 = vadd.f32 %v905_v3, %v897_v2 }
 0x817   :  { %4568 = vtanh.f32 %v5220_v4 }
 0x821   :  { %v4569_v19 = vpop.eup %4568 }
 0x822   :  { %910 = vrot.lane.b32.xlu1 %v4569_v19, %s4832_s7 }
 0x894   :  { %v911_v20 = vpop.permute.xlu1 %910 }
 0x895   :  { %v5244_v23 = vmul.f32 %v4567_v60, %v911_v20 }
 0x897   :  { %921 = vrot.lane.b32.xlu1 %v5244_v23, %s4822_s4 }
 0x909   :  { %v922_v24 = vpop.permute.xlu1 %921 }
 0x90a   :  { %4147 = vmatmul.mubr.msk.f32.vlgmr.msra.gmra.mrb[4].mxu0 %vm468_vm4, %v922_v24 }
 0x90b   :  { %4412 = vmatpush3.bf16.msra.mxu0 %v5046_v50  ;;  %4164 = vmatprep.mubr.msk.f32.mxu0 %vm4827_vm1, %v4826_v10 }
 0x90c   :  { %4413 = vmatprep.subr.bf16.mxu0 %v4828_v49 }
 0x90f   :  { %4415 = vmatpush3.bf16.msra.mxu0 %v5052_v52 }
 0x910   :  { %4425 = vmatprep.subr.bf16.mxu0 %v4828_v49 }
 0x912   :  { %4165 = vmatmul.mubr.msk.f32.vlgmr.msra.gmra.mrb[6].mxu0 %vm468_vm4, %v922_v24 }
 0x913   :  { %4427 = vmatpush3.bf16.msra.mxu0 %v5232_v12  ;;  %4192 = vmatprep.mubr.msk.f32.mxu0 %vm4827_vm1, %v4826_v10 }
 0x914   :  { %4428 = vmatprep.subr.bf16.mxu0 %v4828_v49 }
 0x917   :  { %4430 = vmatpush3.bf16.msra.mxu0 %v5238_v16 }
 0x918   :  { %4431 = vmatprep.subr.bf16.mxu0 %v4828_v49 }
 0x9dd   :  { %v991_v33 = vpop.f32.mrb[4].mxu0 }
 0x9de   :  { %v992_v34 = vadd.f32 %v5275_v31, %v991_v33  ;;  %v4148_v37 = vpop.f32.mrb[5].mxu0 }
 0x9e0   :  { %4570 = vtanh.f32 %v992_v34 }
 0x9e5   :  { %v1143_v39 = vpop.f32.mrb[6].mxu0 }
 0x9e6   :  { %v1144_v40 = vadd.f32 %v5073_v7, %v1143_v39  ;;  %v4166_v41 = vpop.f32.mrb[7].mxu0 }
 0x9e8   :  { %v1154_v42 = vrot.slane %v1144_v40, %v5076_v8 }
 0x9ea   :  { %v4571_v43 = vpop.eup %4570  ;;  %v1155_v46 = vcombine.high %v1154_v42, %v1154_v42  ;;  %v1162_v62 = vrot.slane %v1154_v42, %v5076_v8 }
 0x9eb   :  { %4154 = vmatmul.mubr.msk.f32.vlgmr.msra.gmra.mrb[6].mxu1 %vm145_vm0, %v4571_v43 }
 0x9ec   :  { %v1169_v47 = vrot.slane %v1155_v46, %v5076_v8  ;;  %v1173_v48 = vrot.slane %v1162_v62, %v5084_v17  ;;  %4418 = vmatpush3.bf16.msra.mxu1 %v5154_v1  ;;  %4181 = vmatprep.mubr.msk.f32.mxu1 %vm4827_vm1, %v4826_v10 }
 0x9ed   :  { %4419 = vmatprep.subr.bf16.mxu1 %v4828_v49 }
 0x9ee   :  { %v1181_v15 = vadd.f32 %v1173_v48, %v5087_v21  ;;  %v1180_v51 = vadd.f32 %v1173_v48, %v5089_v22  ;;  %v1177_v53 = vrot.slane %v1169_v47, %v5084_v17  ;;  %v5322_v48 = vld [vmem:[%s5866_s17] ss:$0 sm:$0xff] }
 0x9f0   :  { %v1185_v54 = vmax.f32 %v1181_v15, 0.0  ;;  %v1184_v56 = vmax.f32 %v1180_v51, 0.0  ;;  %v1183_v58 = vadd.f32 %v1177_v53, %v5093_v25  ;;  %v1182_v59 = vadd.f32 %v1177_v53, %v5095_v26  ;;  %4421 = vmatpush3.bf16.msra.mxu1 %v5176_v32 }
 0x9f1   :  { %4422 = vmatprep.subr.bf16.mxu1 %v4828_v49 }
 0x9f2   :  { %v1189_v60 = vmul.f32 %v5103_v30, %v1185_v54  ;;  %v1188_v61 = vmul.f32 %v5103_v30, %v1184_v56  ;;  %v1187_v63 = vmax.f32 %v1183_v58, 0.0  ;;  %v1186_v0 = vmax.f32 %v1182_v59, 0.0 }
 0x9f4   :  { %v1195_v2 = vsel %vm175_vm3, %v1189_v60, 0.0  ;;  %v1192_v3 = vsel %vm175_vm3, %v1188_v61, 0.0  ;;  %v1191_v5 = vmul.f32 %v5103_v30, %v1187_v63  ;;  %v1190_v6 = vmul.f32 %v5103_v30, %v1186_v0  ;;  %4424 = vmatpush3.bf16.msra.mxu1 %v5186_v35 }
 0x9f5   :  { %1196 = vadd.xlane.f32.xlu0 %v1195_v2  ;;  %1193 = vadd.xlane.f32.xlu1 %v1192_v3 }
 0x9f6   :  { %4179 = vmatprep.subr.mxu1 %v4826_v10  ;;  %v1201_v11 = vsel %vm175_vm3, %v1191_v5, 0.0  ;;  %v1198_v13 = vsel %vm175_vm3, %v1190_v6, 0.0 }
 0x9f8   :  { %4180 = vmatpush3.msra.mxu1 %v5195_v36 }
 0x9f9   :  { %1202 = vadd.xlane.f32.xlu0 %v1201_v11  ;;  %1199 = vadd.xlane.f32.xlu1 %v1198_v13 }
 0x9fa   :  { %4434 = vmatprep.subr.bf16.mxu1 %v4828_v49 }
 0xa82   :  { %v1197_v19 = vpop.xlane.xlu0 %1196  ;;  %v1194_v20 = vpop.xlane.xlu1 %1193 }
 0xa83   :  { %v1205_v24 = vadd.f32 %v1197_v19, %v5119_v57  ;;  %v1204_v27 = vadd.f32 %v1194_v20, %v5119_v57 }
 0xa85   :  { %v1219_v34 = vrot.slane %v1205_v24, %v5117_v55  ;;  %v1215_v37 = vrot.slane %v1204_v27, %v5022_v18 }
 0xa86   :  { %v1203_v28 = vpop.xlane.xlu0 %1202  ;;  %v1200_v33 = vpop.xlane.xlu1 %1199 }
 0xa87   :  { %v1207_v39 = vadd.f32 %v1203_v28, %v5119_v57  ;;  %v1206_v40 = vadd.f32 %v1200_v33, %v5119_v57  ;;  %v1220_v43 = vsel %vm631_vm5, %v1219_v34, %v1215_v37 }
 0xa89   :  { %v1228_v41 = vrot.slane %v1207_v39, %v5117_v55  ;;  %v1224_v42 = vrot.slane %v1206_v40, %v5022_v18 }
 0xa8b   :  { %v1229_v46 = vsel %vm631_vm5, %v1228_v41, %v1224_v42 }
 0xa8c   :  { %v1230_v62 = vsel %vm173_vm2, %v1229_v46, %v1220_v43 }
 0xa8d   :  { %v1232_v47 = vsel %vm644_vm6, %v1230_v62, -inf }
 0xa8e   :  { %1233 = vmax.xlane.f32.xlu1 %v1232_v47 }
 0xabe   :  { %v1071_v15 = vpop.f32.mrb[6].mxu1 }
 0xabf   :  { %v1072_v51 = vadd.f32 %v5322_v48, %v1071_v15  ;;  %v4155_v53 = vpop.f32.mrb[7].mxu1 }
 0xac1   :  { %3860 = vst [vmem:[#allocation11] sm:$0x3] %v1072_v51 }
 0xb1b   :  { %v1234_v54 = vpop.xlane.xlu1 %1233 }
 0xb1c   :  { %v1239_v56 = vrot.slane %v1234_v54, %v5084_v17  ;;  %v1243_v58 = vrot.slane %v1234_v54, %v5134_v9 }
 0xb1e   :  { %v1246_v59 = vsub.f32 %v1204_v27, %v1239_v56  ;;  %v1247_v60 = vsub.f32 %v1205_v24, %v1239_v56  ;;  %v1249_v61 = vsub.f32 %v1207_v39, %v1243_v58  ;;  %v1248_v63 = vsub.f32 %v1206_v40, %v1243_v58 }
 0xb20   :  { %v1250_v0 = vmul.f32 1.442695, %v1246_v59  ;;  %v1252_v2 = vmul.f32 1.442695, %v1247_v60  ;;  %v1256_v3 = vmul.f32 1.442695, %v1249_v61 }
 0xb21   :  { %v1254_v5 = vmul.f32 1.442695, %v1248_v63 }
 0xb22   :  { %4572 = vpow2.f32 %v1250_v0 }
 0xb23   :  { %4574 = vpow2.f32 %v1252_v2 }
 0xb24   :  { %4576 = vpow2.f32 %v1256_v3 }
 0xb25   :  { %4578 = vpow2.f32 %v1254_v5 }
 0xb2c   :  { %v4573_v6 = vpop.eup %4572 }
 0xb2d   :  { %v4575_v11 = vpop.eup %4574  ;;  %1263 = vperm.xlu0 %4546, %v4573_v6  }
 0xb2e   :  { %1266 = vperm.xlu1 %4547, %v4575_v11   ;;  %v4577_v13 = vpop.eup %4576 }
 0xb2f   :  { %v4579_v19 = vpop.eup %4578 }
 0xb31   :  { %1272 = vperm.xlu0 %4546, %v4577_v13  }
 0xb32   :  { %1269 = vperm.xlu1 %4547, %v4579_v19  }
 0xbac   :  { %v1264_v20 = vpop.permute.xlu0 %1263 }
 0xbad   :  { %v1267_v24 = vpop.permute.xlu1 %1266  ;;  %v1277_v28 = vrot.slane %v1264_v20, %v5022_v18 }
 0xbae   :  { %v1281_v27 = vrot.slane %v1267_v24, %v5117_v55 }
 0xbb0   :  { %v1273_v33 = vpop.permute.xlu0 %1272  ;;  %v1282_v40 = vsel %vm631_vm5, %v1281_v27, %v1277_v28 }
 0xbb1   :  { %v1270_v34 = vpop.permute.xlu1 %1269  ;;  %v1290_v37 = vrot.slane %v1273_v33, %v5117_v55 }
 0xbb2   :  { %v1286_v39 = vrot.slane %v1270_v34, %v5022_v18 }
 0xbb4   :  { %v1291_v41 = vsel %vm631_vm5, %v1290_v37, %v1286_v39  ;;  %v1076_v37 = vld [vmem:[#allocation3 + $0x2] sm:$0x3] }
 0xbb5   :  { %v1292_v42 = vsel %vm173_vm2, %v1291_v41, %v1282_v40 }
 0xbb6   :  { %v1294_v43 = vsel %vm644_vm6, %v1292_v42, 0.0 }
 0xbb7   :  { %1295 = vadd.xlane.f32.xlu1 %v1294_v43 }
 0xc44   :  { %v1296_v46 = vpop.xlane.xlu1 %1295 }
 0xc45   :  { %4580 = vrcp.f32 %v1296_v46 }
 0xc4f   :  { %v4581_v62 = vpop.eup %4580 }
 0xc50   :  { %v1302_v47 = vrot.slane %v4581_v62, %v5084_v17  ;;  %v1306_v53 = vrot.slane %v4581_v62, %v5134_v9 }
 0xc52   :  { %v1309_v15 = vmul.f32 %v4573_v6, %v1302_v47  ;;  %v1310_v51 = vmul.f32 %v4575_v11, %v1302_v47  ;;  %v1311_v54 = vmul.f32 %v4579_v19, %v1306_v53  ;;  %v1312_v56 = vmul.f32 %v4577_v13, %v1306_v53 }
 0xc54   :  { %1318 = vperm.xlu0 %4546, %v1309_v15  }
 0xc58   :  { %1321 = vperm.xlu0 %4546, %v1310_v51  }
 0xc5c   :  { %1324 = vperm.xlu0 %4546, %v1311_v54  }
 0xc60   :  { %1327 = vperm.xlu0 %4546, %v1312_v56  }
 0xcd3   :  { %v1319_v58 = vpop.permute.xlu0 %1318 }
 0xcd4   :  { %v1332_v60 = vrot.slane %v1319_v58, %v5022_v18 }
 0xcd7   :  { %v1322_v59 = vpop.permute.xlu0 %1321 }
 0xcd8   :  { %v1336_v61 = vrot.slane %v1322_v59, %v5117_v55 }
 0xcda   :  { %v1337_v63 = vsel %vm631_vm5, %v1336_v61, %v1332_v60 }
 0xcdb   :  { %v1325_v0 = vpop.permute.xlu0 %1324  ;;  %v1361_v2 = vmul.f32 %v1337_v63, %v5030_v44 }
 0xcdc   :  { %v1341_v6 = vrot.slane %v1325_v0, %v5022_v18 }
 0xcdd   :  { %v1363_v3 = vsel %vm145_vm0, %v1361_v2, 0.0 }
 0xcde   :  { %1364 = vadd.xlane.f32.xlu0 %v1363_v3 }
 0xcdf   :  { %v1328_v5 = vpop.permute.xlu0 %1327 }
 0xce0   :  { %v1345_v11 = vrot.slane %v1328_v5, %v5117_v55 }
 0xce2   :  { %v1346_v13 = vsel %vm631_vm5, %v1345_v11, %v1341_v6 }
 0xce3   :  { %v1362_v19 = vmul.f32 %v1346_v13, %v5032_v45  ;;  %v3867_v20 = vsel %vm173_vm2, %v1346_v13, %v1337_v63 }
 0xce4   :  { %3879 = vst.msk [vmem:[#allocation12 + $0x2] sm:$0x3] %vm644_vm6, %v3867_v20 }
 0xce5   :  { %v1366_v24 = vsel %vm145_vm0, %v1362_v19, 0.0 }
 0xce6   :  { %1367 = vadd.xlane.f32.xlu1 %v1366_v24 }
 0xcf7   :  { %1381 = vrot.lane.b32.xlu1 %v5244_v23, %s4833_s8 }
 0xd6b   :  { %v1365_v27 = vpop.xlane.xlu0 %1364 }
 0xd6c   :  { %v1374_v33 = vrot.slane %v1365_v27, %v5202_v38 }
 0xd73   :  { %v1368_v28 = vpop.xlane.xlu1 %1367 }
 0xd74   :  { %v1378_v34 = vrot.slane %v1368_v28, %v5202_v38 }
 0xd76   :  { %v1379_v39 = vsel %vm173_vm2, %v1378_v34, %v1374_v33 }
 0xd77   :  { %v1382_v40 = vpop.permute.xlu1 %1381  ;;  %v1384_v41 = vsel %vm145_vm0, %v1076_v37, %v1379_v39 }
 0xd78   :  { %v1385_v42 = vsel %vm805_vm7, %v1384_v41, %v1382_v40 }
 0xd79   :  { %4182 = vmatmul.mubr.msk.f32.vlgmr.msra.gmra.mrb[8].mxu1 %vm813_vm8, %v1385_v42 }
 0xd7a   :  { %4436 = vmatpush3.bf16.msra.mxu1 %v5046_v50  ;;  %4210 = vmatprep.mubr.msk.f32.mxu1 %vm4827_vm1, %v4826_v10 }
 0xd7b   :  { %4437 = vmatprep.subr.bf16.mxu1 %v4828_v49 }
 0xd7e   :  { %4439 = vmatpush3.bf16.msra.mxu1 %v5052_v52 }
 0xd7f   :  { %4449 = vmatprep.subr.bf16.mxu1 %v4828_v49 }
 0xe4c   :  { %v1455_v23 = vpop.f32.mrb[8].mxu1 }
 0xe4d   :  { %v1456_v43 = vadd.f32 %v5215_v14, %v1455_v23  ;;  %v4183_v46 = vpop.f32.mrb[9].mxu1 }
 0xe4f   :  { %4582 = vtanh.f32 %v1456_v43  ;;  %v3941_v47 = vmul.f32 -1.442695, %v1456_v43 }
 0xe51   :  { %4584 = vpow2.f32 %v3941_v47 }
 0xe59   :  { %v4583_v62 = vpop.eup %4582 }
 0xe5a   :  { %1468 = vrot.lane.b32.xlu0 %v4583_v62, %s4832_s7 }
 0xe5b   :  { %v4585_v15 = vpop.eup %4584 }
 0xe5c   :  { %v1462_v51 = vadd.f32 1.0, %v4585_v15 }
 0xe5e   :  { %4586 = vrcp.f32 %v1462_v51 }
 0xe68   :  { %v4587_v53 = vpop.eup %4586 }
 0xe69   :  { %v1466_v58 = vmul.f32 %v4587_v53, %v5220_v4 }
 0xecc   :  { %v1469_v54 = vpop.permute.xlu0 %1468 }
 0xecd   :  { %v1471_v56 = vmul.f32 %v4587_v53, %v1469_v54 }
 0xecf   :  { %1473 = vrot.lane.b32.xlu1 %v1471_v56, %s4822_s4 }
 0xf41   :  { %v1474_v59 = vpop.permute.xlu1 %1473 }
 0xf42   :  { %v5367_v60 = vadd.f32 %v1474_v59, %v1466_v58 }
 0xf44   :  { %4588 = vtanh.f32 %v5367_v60 }
 0xf4e   :  { %v4589_v61 = vpop.eup %4588 }
 0xf4f   :  { %1479 = vrot.lane.b32.xlu1 %v4589_v61, %s4832_s7 }
 0xfc1   :  { %v1480_v63 = vpop.permute.xlu1 %1479 }
 0xfc2   :  { %v5371_v0 = vmul.f32 %v4587_v53, %v1480_v63 }
 0xfc4   :  { %1484 = vrot.lane.b32.xlu1 %v5371_v0, %s4822_s4 }
0x1036   :  { %v1485_v2 = vpop.permute.xlu1 %1484 }
0x1037   :  { %4193 = vmatmul.mubr.msk.f32.vlgmr.msra.gmra.mrb[8].mxu0 %vm468_vm4, %v1485_v2  ;;  %4211 = vmatmul.mubr.msk.f32.vlgmr.msra.gmra.mrb[10].mxu1 %vm468_vm4, %v1485_v2 }
0x1038   :  { %4433 = vmatpush3.bf16.msra.mxu0 %v5268_v29  ;;  %4199 = vmatprep.mubr.msk.f32.mxu0 %vm4827_vm1, %v4826_v10 }
0x1039   :  { %4440 = vmatprep.subr.bf16.mxu0 %v4828_v49  ;;  %4451 = vmatpush3.bf16.msra.mxu1 %v5232_v12 }
0x103a   :  { %4452 = vmatprep.subr.bf16.mxu1 %v4828_v49  ;;  %4238 = vmatprep.mubr.msk.f32.mxu1 %vm4827_vm1, %v4826_v10 }
0x103d   :  { %4454 = vmatpush3.bf16.msra.mxu1 %v5238_v16 }
0x103e   :  { %4455 = vmatprep.subr.bf16.mxu1 %v4828_v49 }
0x110a   :  { %v1554_v4 = vpop.f32.mrb[8].mxu0  ;;  %v1700_v3 = vpop.f32.mrb[10].mxu1 }
0x110b   :  { %v1555_v5 = vadd.f32 %v5275_v31, %v1554_v4  ;;  %v1701_v6 = vadd.f32 %v5073_v7, %v1700_v3  ;;  %v4194_v11 = vpop.f32.mrb[9].mxu0  ;;  %v4212_v13 = vpop.f32.mrb[11].mxu1 }
0x110d   :  { %4590 = vtanh.f32 %v1555_v5  ;;  %v1711_v19 = vrot.slane %v1701_v6, %v5076_v8 }
0x110f   :  { %v1712_v20 = vcombine.high %v1711_v19, %v1711_v19  ;;  %v1719_v24 = vrot.slane %v1711_v19, %v5076_v8 }
0x1111   :  { %v1726_v27 = vrot.slane %v1712_v20, %v5076_v8  ;;  %v1730_v28 = vrot.slane %v1719_v24, %v5084_v17 }
0x1113   :  { %v1738_v33 = vadd.f32 %v1730_v28, %v5087_v21  ;;  %v1737_v34 = vadd.f32 %v1730_v28, %v5089_v22  ;;  %v1734_v37 = vrot.slane %v1726_v27, %v5084_v17 }
0x1115   :  { %v1742_v39 = vmax.f32 %v1738_v33, 0.0  ;;  %v1741_v7 = vmax.f32 %v1737_v34, 0.0  ;;  %v1740_v40 = vadd.f32 %v1734_v37, %v5093_v25  ;;  %v1739_v41 = vadd.f32 %v1734_v37, %v5095_v26 }
0x1117   :  { %v4591_v42 = vpop.eup %4590  ;;  %v1746_v23 = vmul.f32 %v5103_v30, %v1742_v39  ;;  %v1745_v43 = vmul.f32 %v5103_v30, %v1741_v7  ;;  %v1744_v46 = vmax.f32 %v1740_v40, 0.0  ;;  %v1743_v62 = vmax.f32 %v1739_v41, 0.0 }
0x1118   :  { %4200 = vmatmul.mubr.msk.f32.vlgmr.msra.gmra.mrb[10].mxu0 %vm145_vm0, %v4591_v42 }
0x1119   :  { %v1752_v47 = vsel %vm175_vm3, %v1746_v23, 0.0  ;;  %v1749_v15 = vsel %vm175_vm3, %v1745_v43, 0.0  ;;  %v1748_v51 = vmul.f32 %v5103_v30, %v1744_v46  ;;  %v1747_v53 = vmul.f32 %v5103_v30, %v1743_v62  ;;  %4442 = vmatpush3.bf16.msra.mxu0 %v5154_v1  ;;  %4227 = vmatprep.mubr.msk.f32.mxu0 %vm4827_vm1, %v4826_v10 }
0x111a   :  { %1753 = vadd.xlane.f32.xlu0 %v1752_v47  ;;  %1750 = vadd.xlane.f32.xlu1 %v1749_v15 }
0x111b   :  { %4443 = vmatprep.subr.bf16.mxu0 %v4828_v49  ;;  %v1758_v54 = vsel %vm175_vm3, %v1748_v51, 0.0  ;;  %v1755_v56 = vsel %vm175_vm3, %v1747_v53, 0.0 }
0x111d   :  { %4445 = vmatpush3.bf16.msra.mxu0 %v5176_v32 }
0x111e   :  { %1759 = vadd.xlane.f32.xlu1 %v1758_v54  ;;  %1756 = vadd.xlane.f32.xlu0 %v1755_v56 }
0x111f   :  { %4446 = vmatprep.subr.bf16.mxu0 %v4828_v49 }
0x1121   :  { %4448 = vmatpush3.bf16.msra.mxu0 %v5186_v35 }
0x1122   :  { %4225 = vmatprep.subr.mxu0 %v4826_v10 }
0x1125   :  { %4226 = vmatpush3.msra.mxu0 %v5195_v36 }
0x1126   :  { %4458 = vmatprep.subr.bf16.mxu0 %v4828_v49 }
0x11a7   :  { %v1754_v30 = vpop.xlane.xlu0 %1753  ;;  %v1751_v58 = vpop.xlane.xlu1 %1750 }
0x11a8   :  { %v1762_v59 = vadd.f32 %v1754_v30, %v5119_v57  ;;  %v1761_v61 = vadd.f32 %v1751_v58, %v5119_v57 }
0x11aa   :  { %v1776_v4 = vrot.slane %v1762_v59, %v5117_v55  ;;  %v1772_v3 = vrot.slane %v1761_v61, %v5022_v18 }
0x11ab   :  { %v1760_v63 = vpop.xlane.xlu1 %1759  ;;  %v1757_v2 = vpop.xlane.xlu0 %1756 }
0x11ac   :  { %v1764_v5 = vadd.f32 %v1760_v63, %v5119_v57  ;;  %v1763_v6 = vadd.f32 %v1757_v2, %v5119_v57  ;;  %v1777_v19 = vsel %vm631_vm5, %v1776_v4, %v1772_v3 }
0x11ae   :  { %v1785_v11 = vrot.slane %v1764_v5, %v5117_v55  ;;  %v1781_v13 = vrot.slane %v1763_v6, %v5022_v18 }
0x11b0   :  { %v1786_v20 = vsel %vm631_vm5, %v1785_v11, %v1781_v13 }
0x11b1   :  { %v1787_v24 = vsel %vm173_vm2, %v1786_v20, %v1777_v19 }
0x11b2   :  { %v1789_v27 = vsel %vm644_vm6, %v1787_v24, -inf }
0x11b3   :  { %1790 = vmax.xlane.f32.xlu0 %v1789_v27 }
0x11eb   :  { %v1628_v28 = vpop.f32.mrb[10].mxu0 }
0x11ec   :  { %v1629_v33 = vadd.f32 %v5322_v48, %v1628_v28  ;;  %v4201_v34 = vpop.f32.mrb[11].mxu0 }
0x11ee   :  { %3861 = vst [vmem:[#allocation11 + $0x2] sm:$0x3] %v1629_v33 }
0x1240   :  { %v1791_v37 = vpop.xlane.xlu0 %1790 }
0x1241   :  { %v1796_v39 = vrot.slane %v1791_v37, %v5084_v17  ;;  %v1800_v7 = vrot.slane %v1791_v37, %v5134_v9 }
0x1243   :  { %v1803_v40 = vsub.f32 %v1761_v61, %v1796_v39  ;;  %v1804_v41 = vsub.f32 %v1762_v59, %v1796_v39  ;;  %v1805_v42 = vsub.f32 %v1763_v6, %v1800_v7  ;;  %v1806_v46 = vsub.f32 %v1764_v5, %v1800_v7 }
0x1245   :  { %v1807_v23 = vmul.f32 1.442695, %v1803_v40  ;;  %v1809_v43 = vmul.f32 1.442695, %v1804_v41  ;;  %v1811_v62 = vmul.f32 1.442695, %v1805_v42 }
0x1246   :  { %v1813_v47 = vmul.f32 1.442695, %v1806_v46 }
0x1247   :  { %4592 = vpow2.f32 %v1807_v23 }
0x1248   :  { %4594 = vpow2.f32 %v1809_v43 }
0x1249   :  { %4596 = vpow2.f32 %v1811_v62 }
0x124a   :  { %4598 = vpow2.f32 %v1813_v47 }
0x1251   :  { %v4593_v15 = vpop.eup %4592 }
0x1252   :  { %v4595_v51 = vpop.eup %4594  ;;  %1820 = vperm.xlu1 %4547, %v4593_v15  }
0x1253   :  { %1823 = vperm.xlu0 %4546, %v4595_v51   ;;  %v4597_v53 = vpop.eup %4596 }
0x1254   :  { %v4599_v54 = vpop.eup %4598 }
0x1256   :  { %1826 = vperm.xlu1 %4547, %v4597_v53  }
0x125a   :  { %1829 = vperm.xlu1 %4547, %v4599_v54  }
0x12d1   :  { %v1821_v56 = vpop.permute.xlu1 %1820 }
0x12d2   :  { %v1824_v30 = vpop.permute.xlu0 %1823  ;;  %v1834_v61 = vrot.slane %v1821_v56, %v5022_v18 }
0x12d3   :  { %v1838_v59 = vrot.slane %v1824_v30, %v5117_v55 }
0x12d5   :  { %v1827_v58 = vpop.permute.xlu1 %1826  ;;  %v1839_v3 = vsel %vm631_vm5, %v1838_v59, %v1834_v61  ;;  %v1633_v61 = vld [vmem:[#allocation3 + $0x4] sm:$0x3] }
0x12d6   :  { %v1843_v2 = vrot.slane %v1827_v58, %v5022_v18 }
0x12d9   :  { %v1830_v63 = vpop.permute.xlu1 %1829 }
0x12da   :  { %v1847_v4 = vrot.slane %v1830_v63, %v5117_v55 }
0x12dc   :  { %v1848_v5 = vsel %vm631_vm5, %v1847_v4, %v1843_v2 }
0x12dd   :  { %v1849_v6 = vsel %vm173_vm2, %v1848_v5, %v1839_v3 }
0x12de   :  { %v1851_v11 = vsel %vm644_vm6, %v1849_v6, 0.0 }
0x12df   :  { %1852 = vadd.xlane.f32.xlu0 %v1851_v11 }
0x136c   :  { %v1853_v13 = vpop.xlane.xlu0 %1852 }
0x136d   :  { %4600 = vrcp.f32 %v1853_v13 }
0x1377   :  { %v4601_v19 = vpop.eup %4600 }
0x1378   :  { %v1859_v20 = vrot.slane %v4601_v19, %v5084_v17  ;;  %v1863_v28 = vrot.slane %v4601_v19, %v5134_v9 }
0x137a   :  { %v1866_v24 = vmul.f32 %v4593_v15, %v1859_v20  ;;  %v1867_v27 = vmul.f32 %v4595_v51, %v1859_v20  ;;  %v1868_v33 = vmul.f32 %v4597_v53, %v1863_v28  ;;  %v1869_v34 = vmul.f32 %v4599_v54, %v1863_v28 }
0x137c   :  { %1875 = vperm.xlu1 %4547, %v1866_v24  }
0x1380   :  { %1878 = vperm.xlu1 %4547, %v1867_v27  }
0x1384   :  { %1881 = vperm.xlu1 %4547, %v1868_v33  }
0x1388   :  { %1884 = vperm.xlu1 %4547, %v1869_v34  }
0x13fb   :  { %v1876_v37 = vpop.permute.xlu1 %1875 }
0x13fc   :  { %v1889_v7 = vrot.slane %v1876_v37, %v5022_v18 }
0x13ff   :  { %v1879_v39 = vpop.permute.xlu1 %1878 }
0x1400   :  { %v1893_v40 = vrot.slane %v1879_v39, %v5117_v55 }
0x1402   :  { %v1894_v41 = vsel %vm631_vm5, %v1893_v40, %v1889_v7 }
0x1403   :  { %v1882_v42 = vpop.permute.xlu1 %1881  ;;  %v1918_v23 = vmul.f32 %v1894_v41, %v5030_v44 }
0x1404   :  { %v1898_v62 = vrot.slane %v1882_v42, %v5022_v18 }
0x1405   :  { %v1920_v43 = vsel %vm145_vm0, %v1918_v23, 0.0  ;;  %v5496_v23 = vld [vmem:[%s5858_s9] ss:$0 sm:$0xff] }
0x1406   :  { %1921 = vadd.xlane.f32.xlu1 %v1920_v43 }
0x1407   :  { %v1885_v46 = vpop.permute.xlu1 %1884 }
0x1408   :  { %v1902_v47 = vrot.slane %v1885_v46, %v5117_v55 }
0x140a   :  { %v1903_v15 = vsel %vm631_vm5, %v1902_v47, %v1898_v62 }
0x140b   :  { %v1919_v51 = vmul.f32 %v1903_v15, %v5032_v45  ;;  %v3868_v53 = vsel %vm173_vm2, %v1903_v15, %v1894_v41 }
0x140c   :  { %3880 = vst.msk [vmem:[#allocation12 + $0x4] sm:$0x3] %vm644_vm6, %v3868_v53 }
0x140d   :  { %v1923_v54 = vsel %vm145_vm0, %v1919_v51, 0.0 }
0x140e   :  { %1924 = vadd.xlane.f32.xlu0 %v1923_v54 }
0x1424   :  { %1938 = vrot.lane.b32.xlu0 %v5371_v0, %s4833_s8 }
0x1493   :  { %v1922_v56 = vpop.xlane.xlu1 %1921 }
0x1494   :  { %v1931_v58 = vrot.slane %v1922_v56, %v5202_v38 }
0x149b   :  { %v1925_v30 = vpop.xlane.xlu0 %1924 }
0x149c   :  { %v1935_v59 = vrot.slane %v1925_v30, %v5202_v38 }
0x149e   :  { %v1936_v63 = vsel %vm173_vm2, %v1935_v59, %v1931_v58 }
0x149f   :  { %v1939_v2 = vpop.permute.xlu0 %1938  ;;  %v1941_v4 = vsel %vm145_vm0, %v1633_v61, %v1936_v63 }
0x14a0   :  { %v1942_v3 = vsel %vm805_vm7, %v1941_v4, %v1939_v2  ;;  %v5511_v4 = vld [vmem:[%s5859_s10] ss:$0 sm:$0xff] }
0x14a1   :  { %4228 = vmatmul.mubr.msk.f32.vlgmr.msra.gmra.mrb[12].mxu0 %vm813_vm8, %v1942_v3 }
0x14a2   :  { %4460 = vmatpush3.bf16.msra.mxu0 %v5046_v50  ;;  %4256 = vmatprep.mubr.msk.f32.mxu0 %vm4827_vm1, %v4826_v10 }
0x14a3   :  { %4461 = vmatprep.subr.bf16.mxu0 %v4828_v49 }
0x14a6   :  { %4463 = vmatpush3.bf16.msra.mxu0 %v5052_v52 }
0x14a7   :  { %4473 = vmatprep.subr.bf16.mxu0 %v4828_v49 }
0x1574   :  { %v2012_v0 = vpop.f32.mrb[12].mxu0 }
0x1575   :  { %v2013_v5 = vadd.f32 %v5215_v14, %v2012_v0  ;;  %v4229_v6 = vpop.f32.mrb[13].mxu0 }
0x1577   :  { %4602 = vtanh.f32 %v2013_v5  ;;  %v3946_v13 = vmul.f32 -1.442695, %v2013_v5 }
0x1579   :  { %4604 = vpow2.f32 %v3946_v13 }
0x1581   :  { %v4603_v11 = vpop.eup %4602 }
0x1582   :  { %2025 = vrot.lane.b32.xlu1 %v4603_v11, %s4832_s7 }
0x1583   :  { %v4605_v19 = vpop.eup %4604 }
0x1584   :  { %v2019_v20 = vadd.f32 1.0, %v4605_v19 }
0x1586   :  { %4606 = vrcp.f32 %v2019_v20 }
0x1590   :  { %v4607_v24 = vpop.eup %4606 }
0x1591   :  { %v2023_v33 = vmul.f32 %v4607_v24, %v5367_v60 }
0x15f4   :  { %v2026_v27 = vpop.permute.xlu1 %2025 }
0x15f5   :  { %v2028_v28 = vmul.f32 %v4607_v24, %v2026_v27 }
0x15f7   :  { %2030 = vrot.lane.b32.xlu0 %v2028_v28, %s4822_s4 }
0x1669   :  { %v2031_v34 = vpop.permute.xlu0 %2030 }
0x166a   :  { %v5472_v37 = vadd.f32 %v2031_v34, %v2023_v33 }
0x166c   :  { %4608 = vtanh.f32 %v5472_v37 }
0x1676   :  { %v4609_v14 = vpop.eup %4608 }
0x1677   :  { %2036 = vrot.lane.b32.xlu0 %v4609_v14, %s4832_s7 }
0x16e9   :  { %v2037_v39 = vpop.permute.xlu0 %2036 }
0x16ea   :  { %v5476_v7 = vmul.f32 %v4607_v24, %v2037_v39 }
0x16ec   :  { %2041 = vrot.lane.b32.xlu0 %v5476_v7, %s4822_s4 }
0x175e   :  { %v2042_v40 = vpop.permute.xlu0 %2041 }
0x175f   :  { %4239 = vmatmul.mubr.msk.f32.vlgmr.msra.gmra.mrb[12].mxu1 %vm468_vm4, %v2042_v40  ;;  %4257 = vmatmul.mubr.msk.f32.vlgmr.msra.gmra.mrb[14].mxu0 %vm468_vm4, %v2042_v40 }
0x1760   :  { %4457 = vmatpush3.bf16.msra.mxu1 %v5268_v29  ;;  %4245 = vmatprep.mubr.msk.f32.mxu1 %vm4827_vm1, %v4826_v10 }
0x1761   :  { %4464 = vmatprep.subr.bf16.mxu1 %v4828_v49  ;;  %4475 = vmatpush3.bf16.msra.mxu0 %v5232_v12 }
0x1762   :  { %4476 = vmatprep.subr.bf16.mxu0 %v4828_v49  ;;  %4284 = vmatprep.mubr.msk.f32.mxu0 %vm4827_vm1, %v4826_v10 }
0x1765   :  { %4478 = vmatpush3.bf16.msra.mxu0 %v5238_v16 }
0x1766   :  { %4479 = vmatprep.subr.bf16.mxu0 %v4828_v49 }
0x1832   :  { %v2111_v60 = vpop.f32.mrb[12].mxu1  ;;  %v2257_v41 = vpop.f32.mrb[14].mxu0 }
0x1833   :  { %v2112_v42 = vadd.f32 %v5275_v31, %v2111_v60  ;;  %v2258_v43 = vadd.f32 %v5496_v23, %v2257_v41  ;;  %v4240_v46 = vpop.f32.mrb[13].mxu1  ;;  %v4258_v62 = vpop.f32.mrb[15].mxu0 }
0x1835   :  { %4610 = vtanh.f32 %v2112_v42  ;;  %v2268_v47 = vrot.slane %v2258_v43, %v5076_v8 }
0x1837   :  { %v2269_v15 = vcombine.high %v2268_v47, %v2268_v47  ;;  %v2276_v51 = vrot.slane %v2268_v47, %v5076_v8 }
0x1839   :  { %v2283_v53 = vrot.slane %v2269_v15, %v5076_v8  ;;  %v2287_v54 = vrot.slane %v2276_v51, %v5084_v17 }
0x183b   :  { %v2295_v31 = vadd.f32 %v2287_v54, %v5087_v21  ;;  %v2294_v56 = vadd.f32 %v2287_v54, %v5089_v22  ;;  %v2291_v30 = vrot.slane %v2283_v53, %v5084_v17 }
0x183d   :  { %v2299_v58 = vmax.f32 %v2295_v31, 0.0  ;;  %v2298_v59 = vmax.f32 %v2294_v56, 0.0  ;;  %v2296_v61 = vadd.f32 %v2291_v30, %v5095_v26  ;;  %v2297_v63 = vadd.f32 %v2291_v30, %v5093_v25 }
0x183f   :  { %v4611_v2 = vpop.eup %4610  ;;  %v2303_v3 = vmul.f32 %v5511_v4, %v2299_v58  ;;  %v2302_v0 = vmul.f32 %v5511_v4, %v2298_v59  ;;  %v2300_v5 = vmax.f32 %v2296_v61, 0.0  ;;  %v2301_v19 = vmax.f32 %v2297_v63, 0.0 }
0x1840   :  { %4246 = vmatmul.mubr.msk.f32.vlgmr.msra.gmra.mrb[14].mxu1 %vm145_vm0, %v4611_v2 }
0x1841   :  { %v2309_v6 = vsel %vm175_vm3, %v2303_v3, 0.0  ;;  %v2306_v11 = vsel %vm175_vm3, %v2302_v0, 0.0  ;;  %v2304_v13 = vmul.f32 %v5511_v4, %v2300_v5  ;;  %4466 = vmatpush3.bf16.msra.mxu1 %v5154_v1  ;;  %4273 = vmatprep.mubr.msk.f32.mxu1 %vm4827_vm1, %v4826_v10  ;;  %v2305_v24 = vmul.f32 %v5511_v4, %v2301_v19 }
0x1842   :  { %2310 = vadd.xlane.f32.xlu1 %v2309_v6  ;;  %2307 = vadd.xlane.f32.xlu0 %v2306_v11 }
0x1843   :  { %4467 = vmatprep.subr.bf16.mxu1 %v4828_v49  ;;  %v2312_v20 = vsel %vm175_vm3, %v2304_v13, 0.0  ;;  %v2315_v27 = vsel %vm175_vm3, %v2305_v24, 0.0 }
0x1845   :  { %4469 = vmatpush3.bf16.msra.mxu1 %v5176_v32 }
0x1846   :  { %2313 = vadd.xlane.f32.xlu0 %v2312_v20  ;;  %4470 = vmatprep.subr.bf16.mxu1 %v4828_v49 }
0x1849   :  { %4472 = vmatpush3.bf16.msra.mxu1 %v5186_v35 }
0x184a   :  { %2316 = vadd.xlane.f32.xlu0 %v2315_v27  ;;  %4271 = vmatprep.subr.mxu1 %v4826_v10 }
0x184d   :  { %4272 = vmatpush3.msra.mxu1 %v5195_v36 }
0x184e   :  { %4482 = vmatprep.subr.bf16.mxu1 %v4828_v49 }
0x18cf   :  { %v2308_v28 = vpop.xlane.xlu0 %2307  ;;  %v2311_v33 = vpop.xlane.xlu1 %2310 }
0x18d0   :  { %v2319_v14 = vadd.f32 %v2311_v33, %v5119_v57  ;;  %v2318_v39 = vadd.f32 %v2308_v28, %v5119_v57 }
0x18d2   :  { %v2333_v41 = vrot.slane %v2319_v14, %v5117_v55  ;;  %v2329_v42 = vrot.slane %v2318_v39, %v5022_v18 }
0x18d3   :  { %v2314_v34 = vpop.xlane.xlu0 %2313 }
0x18d4   :  { %v2320_v40 = vadd.f32 %v2314_v34, %v5119_v57  ;;  %v2334_v62 = vsel %vm631_vm5, %v2333_v41, %v2329_v42 }
0x18d6   :  { %v2338_v36 = vrot.slane %v2320_v40, %v5022_v18 }
0x18d7   :  { %v2317_v60 = vpop.xlane.xlu0 %2316 }
0x18d8   :  { %v2321_v43 = vadd.f32 %v2317_v60, %v5119_v57 }
0x18da   :  { %v2342_v46 = vrot.slane %v2321_v43, %v5117_v55 }
0x18dc   :  { %v2343_v47 = vsel %vm631_vm5, %v2342_v46, %v2338_v36 }
0x18dd   :  { %v2344_v15 = vsel %vm173_vm2, %v2343_v47, %v2334_v62 }
0x18de   :  { %v2346_v51 = vsel %vm644_vm6, %v2344_v15, -inf }
0x18df   :  { %2347 = vmax.xlane.f32.xlu1 %v2346_v51 }
0x1913   :  { %v2185_v53 = vpop.f32.mrb[14].mxu1 }
0x1914   :  { %v2186_v54 = vadd.f32 %v5322_v48, %v2185_v53  ;;  %v4247_v31 = vpop.f32.mrb[15].mxu1 }
0x1916   :  { %3862 = vst [vmem:[#allocation11 + $0x4] sm:$0x3] %v2186_v54 }
0x196c   :  { %v2348_v56 = vpop.xlane.xlu1 %2347 }
0x196d   :  { %v2353_v30 = vrot.slane %v2348_v56, %v5084_v17  ;;  %v2357_v58 = vrot.slane %v2348_v56, %v5134_v9 }
0x196f   :  { %v2360_v59 = vsub.f32 %v2318_v39, %v2353_v30  ;;  %v2361_v61 = vsub.f32 %v2319_v14, %v2353_v30  ;;  %v2363_v63 = vsub.f32 %v2321_v43, %v2357_v58  ;;  %v2362_v2 = vsub.f32 %v2320_v40, %v2357_v58 }
0x1971   :  { %v2364_v3 = vmul.f32 1.442695, %v2360_v59  ;;  %v2366_v0 = vmul.f32 1.442695, %v2361_v61  ;;  %v2370_v5 = vmul.f32 1.442695, %v2363_v63 }
0x1972   :  { %v2368_v6 = vmul.f32 1.442695, %v2362_v2 }
0x1973   :  { %4612 = vpow2.f32 %v2364_v3 }
0x1974   :  { %4614 = vpow2.f32 %v2366_v0 }
0x1975   :  { %4616 = vpow2.f32 %v2370_v5 }
0x1976   :  { %4618 = vpow2.f32 %v2368_v6 }
0x197d   :  { %v4613_v48 = vpop.eup %4612 }
0x197e   :  { %v4615_v11 = vpop.eup %4614  ;;  %2377 = vperm.xlu0 %4546, %v4613_v48  }
0x197f   :  { %2380 = vperm.xlu1 %4547, %v4615_v11   ;;  %v4617_v13 = vpop.eup %4616 }
0x1980   :  { %v4619_v19 = vpop.eup %4618 }
0x1982   :  { %2386 = vperm.xlu0 %4546, %v4617_v13  }
0x1983   :  { %2383 = vperm.xlu1 %4547, %v4619_v19  }
0x19fd   :  { %v2378_v20 = vpop.permute.xlu0 %2377 }
0x19fe   :  { %v2381_v24 = vpop.permute.xlu1 %2380  ;;  %v2391_v28 = vrot.slane %v2378_v20, %v5022_v18 }
0x19ff   :  { %v2395_v27 = vrot.slane %v2381_v24, %v5117_v55 }
0x1a01   :  { %v2387_v33 = vpop.permute.xlu0 %2386  ;;  %v2396_v40 = vsel %vm631_vm5, %v2395_v27, %v2391_v28  ;;  %v2190_v27 = vld [vmem:[#allocation3 + $0x6] sm:$0x3] }
0x1a02   :  { %v2384_v34 = vpop.permute.xlu1 %2383  ;;  %v2404_v14 = vrot.slane %v2387_v33, %v5117_v55 }
0x1a03   :  { %v2400_v39 = vrot.slane %v2384_v34, %v5022_v18 }
0x1a05   :  { %v2405_v60 = vsel %vm631_vm5, %v2404_v14, %v2400_v39  ;;  %v5586_v39 = vld [vmem:[%s5862_s13] ss:$0 sm:$0xff] }
0x1a06   :  { %v2406_v41 = vsel %vm173_vm2, %v2405_v60, %v2396_v40 }
0x1a07   :  { %v2408_v42 = vsel %vm644_vm6, %v2406_v41, 0.0 }
0x1a08   :  { %2409 = vadd.xlane.f32.xlu1 %v2408_v42 }
0x1a95   :  { %v2410_v43 = vpop.xlane.xlu1 %2409 }
0x1a96   :  { %4620 = vrcp.f32 %v2410_v43 }
0x1aa0   :  { %v4621_v36 = vpop.eup %4620 }
0x1aa1   :  { %v2416_v46 = vrot.slane %v4621_v36, %v5084_v17  ;;  %v2420_v15 = vrot.slane %v4621_v36, %v5134_v9 }
0x1aa3   :  { %v2423_v62 = vmul.f32 %v4613_v48, %v2416_v46  ;;  %v2424_v47 = vmul.f32 %v4615_v11, %v2416_v46  ;;  %v2425_v51 = vmul.f32 %v4619_v19, %v2420_v15  ;;  %v2426_v53 = vmul.f32 %v4617_v13, %v2420_v15 }
0x1aa5   :  { %2432 = vperm.xlu0 %4546, %v2423_v62  }
0x1aa9   :  { %2435 = vperm.xlu0 %4546, %v2424_v47  }
0x1aad   :  { %2438 = vperm.xlu0 %4546, %v2425_v51  }
0x1ab1   :  { %2441 = vperm.xlu0 %4546, %v2426_v53  }
0x1b24   :  { %v2433_v54 = vpop.permute.xlu0 %2432 }
0x1b25   :  { %v2446_v56 = vrot.slane %v2433_v54, %v5022_v18 }
0x1b28   :  { %v2436_v31 = vpop.permute.xlu0 %2435 }
0x1b29   :  { %v2450_v30 = vrot.slane %v2436_v31, %v5117_v55 }
0x1b2b   :  { %v2451_v58 = vsel %vm631_vm5, %v2450_v30, %v2446_v56 }
0x1b2c   :  { %v2439_v59 = vpop.permute.xlu0 %2438  ;;  %v2475_v61 = vmul.f32 %v2451_v58, %v5030_v44 }
0x1b2d   :  { %v2455_v3 = vrot.slane %v2439_v59, %v5022_v18  ;;  %v5615_v59 = vld [vmem:[%s5864_s15] ss:$0 sm:$0xff] }
0x1b2e   :  { %v2477_v63 = vsel %vm145_vm0, %v2475_v61, 0.0 }
0x1b2f   :  { %2478 = vadd.xlane.f32.xlu0 %v2477_v63 }
0x1b30   :  { %v2442_v2 = vpop.permute.xlu0 %2441 }
0x1b31   :  { %v2459_v0 = vrot.slane %v2442_v2, %v5117_v55 }
0x1b33   :  { %v2460_v5 = vsel %vm631_vm5, %v2459_v0, %v2455_v3 }
0x1b34   :  { %v2476_v6 = vmul.f32 %v2460_v5, %v5032_v45  ;;  %v3869_v48 = vsel %vm173_vm2, %v2460_v5, %v2451_v58 }
0x1b35   :  { %3881 = vst.msk [vmem:[#allocation12 + $0x6] sm:$0x3] %vm644_vm6, %v3869_v48 }
0x1b36   :  { %v2480_v11 = vsel %vm145_vm0, %v2476_v6, 0.0 }
0x1b37   :  { %2481 = vadd.xlane.f32.xlu1 %v2480_v11 }
0x1b48   :  { %2495 = vrot.lane.b32.xlu1 %v5476_v7, %s4833_s8 }
0x1bbc   :  { %v2479_v13 = vpop.xlane.xlu0 %2478 }
0x1bbd   :  { %v2488_v20 = vrot.slane %v2479_v13, %v5202_v38 }
0x1bc4   :  { %v2482_v19 = vpop.xlane.xlu1 %2481 }
0x1bc5   :  { %v2492_v24 = vrot.slane %v2482_v19, %v5202_v38 }
0x1bc7   :  { %v2493_v28 = vsel %vm173_vm2, %v2492_v24, %v2488_v20 }
0x1bc8   :  { %v2496_v33 = vpop.permute.xlu1 %2495  ;;  %v2498_v34 = vsel %vm145_vm0, %v2190_v27, %v2493_v28 }
0x1bc9   :  { %v2499_v14 = vsel %vm805_vm7, %v2498_v34, %v2496_v33 }
0x1bca   :  { %4274 = vmatmul.mubr.msk.f32.vlgmr.msra.gmra.mrb[16].mxu1 %vm813_vm8, %v2499_v14 }
0x1bcb   :  { %4484 = vmatpush3.bf16.msra.mxu1 %v5046_v50  ;;  %4302 = vmatprep.mubr.msk.f32.mxu1 %vm4827_vm1, %v4826_v10 }
0x1bcc   :  { %4485 = vmatprep.subr.bf16.mxu1 %v4828_v49 }
0x1bcf   :  { %4487 = vmatpush3.bf16.msra.mxu1 %v5052_v52 }
0x1bd0   :  { %4497 = vmatprep.subr.bf16.mxu1 %v4828_v49 }
0x1c9d   :  { %v2569_v7 = vpop.f32.mrb[16].mxu1 }
0x1c9e   :  { %v2570_v40 = vadd.f32 %v5586_v39, %v2569_v7  ;;  %v4275_v60 = vpop.f32.mrb[17].mxu1 }
0x1ca0   :  { %4622 = vtanh.f32 %v2570_v40  ;;  %v3951_v42 = vmul.f32 -1.442695, %v2570_v40 }
0x1ca2   :  { %4624 = vpow2.f32 %v3951_v42 }
0x1caa   :  { %v4623_v41 = vpop.eup %4622 }
0x1cab   :  { %2582 = vrot.lane.b32.xlu0 %v4623_v41, %s4832_s7 }
0x1cac   :  { %v4625_v43 = vpop.eup %4624 }
0x1cad   :  { %v2576_v36 = vadd.f32 1.0, %v4625_v43 }
0x1caf   :  { %4626 = vrcp.f32 %v2576_v36 }
0x1cb9   :  { %v4627_v46 = vpop.eup %4626 }
0x1cba   :  { %v2580_v15 = vmul.f32 %v4627_v46, %v5472_v37 }
0x1d1d   :  { %v2583_v62 = vpop.permute.xlu0 %2582 }
0x1d1e   :  { %v2585_v47 = vmul.f32 %v4627_v46, %v2583_v62 }
0x1d20   :  { %2587 = vrot.lane.b32.xlu1 %v2585_v47, %s4822_s4  ;;  %v5648_v47 = vld [vmem:[%s5861_s12 + $0x30] sm:$0xff] }
0x1d92   :  { %v2588_v51 = vpop.permute.xlu1 %2587 }
0x1d93   :  { %v5592_v53 = vadd.f32 %v2588_v51, %v2580_v15 }
0x1d95   :  { %4628 = vtanh.f32 %v5592_v53 }
0x1d9f   :  { %v4629_v54 = vpop.eup %4628 }
0x1da0   :  { %2593 = vrot.lane.b32.xlu1 %v4629_v54, %s4832_s7 }
0x1e12   :  { %v2594_v31 = vpop.permute.xlu1 %2593 }
0x1e13   :  { %v5596_v56 = vmul.f32 %v4627_v46, %v2594_v31 }
0x1e15   :  { %2598 = vrot.lane.b32.xlu1 %v5596_v56, %s4822_s4 }
0x1e87   :  { %v2599_v30 = vpop.permute.xlu1 %2598 }
0x1e88   :  { %4285 = vmatmul.mubr.msk.f32.vlgmr.msra.gmra.mrb[16].mxu0 %vm468_vm4, %v2599_v30  ;;  %4303 = vmatmul.mubr.msk.f32.vlgmr.msra.gmra.mrb[18].mxu1 %vm468_vm4, %v2599_v30 }
0x1e89   :  { %4481 = vmatpush3.bf16.msra.mxu0 %v5268_v29  ;;  %4291 = vmatprep.mubr.msk.f32.mxu0 %vm4827_vm1, %v4826_v10 }
0x1e8a   :  { %4488 = vmatprep.subr.bf16.mxu0 %v4828_v49  ;;  %4499 = vmatpush3.bf16.msra.mxu1 %v5232_v12 }
0x1e8b   :  { %4500 = vmatprep.subr.bf16.mxu1 %v4828_v49  ;;  %4330 = vmatprep.mubr.msk.f32.mxu1 %vm4827_vm1, %v4826_v10 }
0x1e8e   :  { %4502 = vmatpush3.bf16.msra.mxu1 %v5238_v16 }
0x1e8f   :  { %4503 = vmatprep.subr.bf16.mxu1 %v4828_v49 }
0x1f5b   :  { %v2668_v37 = vpop.f32.mrb[16].mxu0  ;;  %v2814_v58 = vpop.f32.mrb[18].mxu1 }
0x1f5c   :  { %v2669_v61 = vadd.f32 %v5615_v59, %v2668_v37  ;;  %v2815_v63 = vadd.f32 %v5496_v23, %v2814_v58  ;;  %v4286_v2 = vpop.f32.mrb[17].mxu0  ;;  %v4304_v3 = vpop.f32.mrb[19].mxu1 }
0x1f5e   :  { %4630 = vtanh.f32 %v2669_v61  ;;  %v2825_v0 = vrot.slane %v2815_v63, %v5076_v8 }
0x1f60   :  { %v2826_v5 = vcombine.high %v2825_v0, %v2825_v0  ;;  %v2833_v6 = vrot.slane %v2825_v0, %v5076_v8 }
0x1f62   :  { %v2840_v48 = vrot.slane %v2826_v5, %v5076_v8  ;;  %v2844_v11 = vrot.slane %v2833_v6, %v5084_v17 }
0x1f64   :  { %v2852_v13 = vadd.f32 %v2844_v11, %v5087_v21  ;;  %v2851_v19 = vadd.f32 %v2844_v11, %v5089_v22  ;;  %v2848_v20 = vrot.slane %v2840_v48, %v5084_v17 }
0x1f66   :  { %v2856_v24 = vmax.f32 %v2852_v13, 0.0  ;;  %v2855_v27 = vmax.f32 %v2851_v19, 0.0  ;;  %v2854_v28 = vadd.f32 %v2848_v20, %v5093_v25  ;;  %v2853_v33 = vadd.f32 %v2848_v20, %v5095_v26  ;;  %v5667_v19 = vld [vmem:[%s5866_s17] ss:$0 sm:$0xff]  ;;  %s4834_s17 = smov [#allocation12]  }
0x1f68   :  { %v4631_v34 = vpop.eup %4630  ;;  %v2860_v14 = vmul.f32 %v5511_v4, %v2856_v24  ;;  %v2859_v7 = vmul.f32 %v5511_v4, %v2855_v27  ;;  %v2858_v40 = vmax.f32 %v2854_v28, 0.0  ;;  %v2857_v60 = vmax.f32 %v2853_v33, 0.0 }
0x1f69   :  { %4292 = vmatmul.mubr.msk.f32.vlgmr.msra.gmra.mrb[18].mxu0 %vm145_vm0, %v4631_v34 }
0x1f6a   :  { %v2866_v41 = vsel %vm175_vm3, %v2860_v14, 0.0  ;;  %v2863_v42 = vsel %vm175_vm3, %v2859_v7, 0.0  ;;  %v2862_v43 = vmul.f32 %v5511_v4, %v2858_v40  ;;  %v2861_v36 = vmul.f32 %v5511_v4, %v2857_v60  ;;  %4490 = vmatpush3.bf16.msra.mxu0 %v5154_v1  ;;  %4319 = vmatprep.mubr.msk.f32.mxu0 %vm4827_vm1, %v4826_v10 }
0x1f6b   :  { %2867 = vadd.xlane.f32.xlu0 %v2866_v41  ;;  %2864 = vadd.xlane.f32.xlu1 %v2863_v42 }
0x1f6c   :  { %4491 = vmatprep.subr.bf16.mxu0 %v4828_v49  ;;  %v2872_v46 = vsel %vm175_vm3, %v2862_v43, 0.0  ;;  %v2869_v62 = vsel %vm175_vm3, %v2861_v36, 0.0 }
0x1f6e   :  { %4493 = vmatpush3.bf16.msra.mxu0 %v5176_v32 }
0x1f6f   :  { %2873 = vadd.xlane.f32.xlu1 %v2872_v46  ;;  %2870 = vadd.xlane.f32.xlu0 %v2869_v62 }
0x1f70   :  { %4494 = vmatprep.subr.bf16.mxu0 %v4828_v49 }
0x1f72   :  { %4496 = vmatpush3.bf16.msra.mxu0 %v5186_v35 }
0x1f73   :  { %4317 = vmatprep.subr.mxu0 %v4826_v10 }
0x1f76   :  { %4318 = vmatpush3.msra.mxu0 %v5648_v47 }
0x1f77   :  { %4506 = vmatprep.subr.bf16.mxu0 %v4828_v49 }
0x1ff8   :  { %v2868_v15 = vpop.xlane.xlu0 %2867  ;;  %v2865_v51 = vpop.xlane.xlu1 %2864 }
0x1ff9   :  { %v2876_v54 = vadd.f32 %v2868_v15, %v5119_v57  ;;  %v2875_v31 = vadd.f32 %v2865_v51, %v5119_v57 }
0x1ffb   :  { %v2890_v58 = vrot.slane %v2876_v54, %v5117_v55  ;;  %v2886_v61 = vrot.slane %v2875_v31, %v5022_v18 }
0x1ffc   :  { %v2874_v30 = vpop.xlane.xlu1 %2873  ;;  %v2871_v37 = vpop.xlane.xlu0 %2870 }
0x1ffd   :  { %v2878_v63 = vadd.f32 %v2874_v30, %v5119_v57  ;;  %v2877_v2 = vadd.f32 %v2871_v37, %v5119_v57  ;;  %v2891_v5 = vsel %vm631_vm5, %v2890_v58, %v2886_v61 }
0x1fff   :  { %v2899_v3 = vrot.slane %v2878_v63, %v5117_v55  ;;  %v2895_v0 = vrot.slane %v2877_v2, %v5022_v18 }
0x2001   :  { %v2900_v6 = vsel %vm631_vm5, %v2899_v3, %v2895_v0 }
0x2002   :  { %v2901_v48 = vsel %vm173_vm2, %v2900_v6, %v2891_v5 }
0x2003   :  { %v2903_v11 = vsel %vm644_vm6, %v2901_v48, -inf }
0x2004   :  { %2904 = vmax.xlane.f32.xlu0 %v2903_v11 }
0x203c   :  { %v2742_v13 = vpop.f32.mrb[18].mxu0 }
0x203d   :  { %v2743_v20 = vadd.f32 %v5667_v19, %v2742_v13  ;;  %v4293_v24 = vpop.f32.mrb[19].mxu0 }
0x203f   :  { %3863 = vst [vmem:[#allocation11 + $0x6] sm:$0x3] %v2743_v20 }
0x2091   :  { %v2905_v27 = vpop.xlane.xlu0 %2904 }
0x2092   :  { %v2910_v28 = vrot.slane %v2905_v27, %v5084_v17  ;;  %v2914_v33 = vrot.slane %v2905_v27, %v5134_v9 }
0x2094   :  { %v2917_v34 = vsub.f32 %v2875_v31, %v2910_v28  ;;  %v2918_v14 = vsub.f32 %v2876_v54, %v2910_v28  ;;  %v2919_v7 = vsub.f32 %v2877_v2, %v2914_v33  ;;  %v2920_v41 = vsub.f32 %v2878_v63, %v2914_v33 }
0x2096   :  { %v2921_v40 = vmul.f32 1.442695, %v2917_v34  ;;  %v2923_v60 = vmul.f32 1.442695, %v2918_v14  ;;  %v2925_v42 = vmul.f32 1.442695, %v2919_v7 }
0x2097   :  { %v2927_v43 = vmul.f32 1.442695, %v2920_v41 }
0x2098   :  { %4632 = vpow2.f32 %v2921_v40 }
0x2099   :  { %4634 = vpow2.f32 %v2923_v60 }
0x209a   :  { %4636 = vpow2.f32 %v2925_v42 }
0x209b   :  { %4638 = vpow2.f32 %v2927_v43 }
0x20a2   :  { %v4633_v36 = vpop.eup %4632 }
0x20a3   :  { %v4635_v46 = vpop.eup %4634  ;;  %2934 = vperm.xlu1 %4547, %v4633_v36  }
0x20a4   :  { %2937 = vperm.xlu0 %4546, %v4635_v46   ;;  %v4637_v62 = vpop.eup %4636 }
0x20a5   :  { %v4639_v15 = vpop.eup %4638 }
0x20a7   :  { %2940 = vperm.xlu1 %4547, %v4637_v62  }
0x20ab   :  { %2943 = vperm.xlu1 %4547, %v4639_v15  }
0x2122   :  { %v2935_v51 = vpop.permute.xlu1 %2934 }
0x2123   :  { %v2938_v54 = vpop.permute.xlu0 %2937  ;;  %v2948_v37 = vrot.slane %v2935_v51, %v5022_v18 }
0x2124   :  { %v2952_v30 = vrot.slane %v2938_v54, %v5117_v55 }
0x2126   :  { %v2941_v31 = vpop.permute.xlu1 %2940  ;;  %v2953_v2 = vsel %vm631_vm5, %v2952_v30, %v2948_v37 }
0x2127   :  { %v2957_v61 = vrot.slane %v2941_v31, %v5022_v18 }
0x212a   :  { %v2944_v58 = vpop.permute.xlu1 %2943 }
0x212b   :  { %v2961_v63 = vrot.slane %v2944_v58, %v5117_v55 }
0x212d   :  { %v2962_v3 = vsel %vm631_vm5, %v2961_v63, %v2957_v61  ;;  %v2747_v61 = vld [vmem:[#allocation3 + $0x8] sm:$0x3] }
0x212e   :  { %v2963_v0 = vsel %vm173_vm2, %v2962_v3, %v2953_v2 }
0x212f   :  { %v2965_v5 = vsel %vm644_vm6, %v2963_v0, 0.0 }
0x2130   :  { %2966 = vadd.xlane.f32.xlu0 %v2965_v5 }
0x21bd   :  { %v2967_v6 = vpop.xlane.xlu0 %2966 }
0x21be   :  { %4640 = vrcp.f32 %v2967_v6 }
0x21c8   :  { %v4641_v48 = vpop.eup %4640 }
0x21c9   :  { %v2973_v11 = vrot.slane %v4641_v48, %v5084_v17  ;;  %v2977_v24 = vrot.slane %v4641_v48, %v5134_v9 }
0x21cb   :  { %v2980_v13 = vmul.f32 %v4633_v36, %v2973_v11  ;;  %v2981_v20 = vmul.f32 %v4635_v46, %v2973_v11  ;;  %v2982_v27 = vmul.f32 %v4637_v62, %v2977_v24  ;;  %v2983_v28 = vmul.f32 %v4639_v15, %v2977_v24 }
0x21cd   :  { %2989 = vperm.xlu1 %4547, %v2980_v13  }
0x21d1   :  { %2992 = vperm.xlu1 %4547, %v2981_v20  }
0x21d5   :  { %2995 = vperm.xlu1 %4547, %v2982_v27  }
0x21d9   :  { %2998 = vperm.xlu1 %4547, %v2983_v28  }
0x224c   :  { %v2990_v33 = vpop.permute.xlu1 %2989 }
0x224d   :  { %v3003_v14 = vrot.slane %v2990_v33, %v5022_v18 }
0x2250   :  { %v2993_v34 = vpop.permute.xlu1 %2992 }
0x2251   :  { %v3007_v7 = vrot.slane %v2993_v34, %v5117_v55 }
0x2253   :  { %v3008_v40 = vsel %vm631_vm5, %v3007_v7, %v3003_v14 }
0x2254   :  { %v2996_v60 = vpop.permute.xlu1 %2995  ;;  %v3032_v41 = vmul.f32 %v3008_v40, %v5030_v44 }
0x2255   :  { %v3012_v36 = vrot.slane %v2996_v60, %v5022_v18 }
0x2256   :  { %v3034_v42 = vsel %vm145_vm0, %v3032_v41, 0.0 }
0x2257   :  { %3035 = vadd.xlane.f32.xlu1 %v3034_v42 }
0x2258   :  { %v2999_v43 = vpop.permute.xlu1 %2998 }
0x2259   :  { %v3016_v46 = vrot.slane %v2999_v43, %v5117_v55 }
0x225b   :  { %v3017_v62 = vsel %vm631_vm5, %v3016_v46, %v3012_v36 }
0x225c   :  { %v3033_v15 = vmul.f32 %v3017_v62, %v5032_v45  ;;  %v3870_v51 = vsel %vm173_vm2, %v3017_v62, %v3008_v40 }
0x225d   :  { %3882 = vst.msk [vmem:[#allocation12 + $0x8] sm:$0x3] %vm644_vm6, %v3870_v51 }
0x225e   :  { %v3037_v54 = vsel %vm145_vm0, %v3033_v15, 0.0 }
0x225f   :  { %3038 = vadd.xlane.f32.xlu0 %v3037_v54 }
0x2275   :  { %3052 = vrot.lane.b32.xlu0 %v5596_v56, %s4833_s8 }
0x22e4   :  { %v3036_v31 = vpop.xlane.xlu1 %3035 }
0x22e5   :  { %v3045_v37 = vrot.slane %v3036_v31, %v5202_v38 }
0x22ec   :  { %v3039_v30 = vpop.xlane.xlu0 %3038 }
0x22ed   :  { %v3049_v58 = vrot.slane %v3039_v30, %v5202_v38 }
0x22ef   :  { %v3050_v63 = vsel %vm173_vm2, %v3049_v58, %v3045_v37 }
0x22f0   :  { %v3053_v2 = vpop.permute.xlu0 %3052  ;;  %v3055_v3 = vsel %vm145_vm0, %v2747_v61, %v3050_v63 }
0x22f1   :  { %v3056_v0 = vsel %vm805_vm7, %v3055_v3, %v3053_v2 }
0x22f2   :  { %4320 = vmatmul.mubr.msk.f32.vlgmr.msra.gmra.mrb[20].mxu0 %vm813_vm8, %v3056_v0 }
0x22f3   :  { %4508 = vmatpush3.bf16.msra.mxu0 %v5046_v50  ;;  %4348 = vmatprep.mubr.msk.f32.mxu0 %vm4827_vm1, %v4826_v10 }
0x22f4   :  { %4509 = vmatprep.subr.bf16.mxu0 %v4828_v49 }
0x22f7   :  { %4511 = vmatpush3.bf16.msra.mxu0 %v5052_v52 }
0x22f8   :  { %4521 = vmatprep.subr.bf16.mxu0 %v4828_v49 }
0x23c5   :  { %v3126_v56 = vpop.f32.mrb[20].mxu0 }
0x23c6   :  { %v3127_v5 = vadd.f32 %v5586_v39, %v3126_v56  ;;  %v4321_v6 = vpop.f32.mrb[21].mxu0 }
0x23c8   :  { %4642 = vtanh.f32 %v3127_v5  ;;  %v3956_v11 = vmul.f32 -1.442695, %v3127_v5 }
0x23ca   :  { %4644 = vpow2.f32 %v3956_v11 }
0x23d2   :  { %v4643_v48 = vpop.eup %4642 }
0x23d3   :  { %3139 = vrot.lane.b32.xlu1 %v4643_v48, %s4832_s7 }
0x23d4   :  { %v4645_v50 = vpop.eup %4644 }
0x23d5   :  { %v3133_v13 = vadd.f32 1.0, %v4645_v50 }
0x23d7   :  { %4646 = vrcp.f32 %v3133_v13 }
0x23e1   :  { %v4647_v20 = vpop.eup %4646 }
0x23e2   :  { %v3137_v52 = vmul.f32 %v4647_v20, %v5592_v53 }
0x2445   :  { %v3140_v24 = vpop.permute.xlu1 %3139 }
0x2446   :  { %v3142_v27 = vmul.f32 %v4647_v20, %v3140_v24 }
0x2448   :  { %3144 = vrot.lane.b32.xlu0 %v3142_v27, %s4822_s4 }
0x24ba   :  { %v3145_v28 = vpop.permute.xlu0 %3144 }
0x24bb   :  { %v5712_v33 = vadd.f32 %v3145_v28, %v3137_v52 }
0x24bd   :  { %4648 = vtanh.f32 %v5712_v33 }
0x24c7   :  { %v4649_v34 = vpop.eup %4648 }
0x24c8   :  { %3150 = vrot.lane.b32.xlu0 %v4649_v34, %s4832_s7 }
0x253a   :  { %v3151_v14 = vpop.permute.xlu0 %3150 }
0x253b   :  { %v5716_v7 = vmul.f32 %v4647_v20, %v3151_v14 }
0x253d   :  { %3155 = vrot.lane.b32.xlu0 %v5716_v7, %s4822_s4 }
0x25af   :  { %v3156_v40 = vpop.permute.xlu0 %3155 }
0x25b0   :  { %4331 = vmatmul.mubr.msk.f32.vlgmr.msra.gmra.mrb[20].mxu1 %vm468_vm4, %v3156_v40  ;;  %4349 = vmatmul.mubr.msk.f32.vlgmr.msra.gmra.mrb[22].mxu0 %vm468_vm4, %v3156_v40 }
0x25b1   :  { %4505 = vmatpush3.bf16.msra.mxu1 %v5268_v29  ;;  %4337 = vmatprep.mubr.msk.f32.mxu1 %vm4827_vm1, %v4826_v10 }
0x25b2   :  { %4512 = vmatprep.subr.bf16.mxu1 %v4828_v49  ;;  %4523 = vmatpush3.bf16.msra.mxu0 %v5232_v12 }
0x25b3   :  { %4524 = vmatprep.subr.bf16.mxu0 %v4828_v49  ;;  %4376 = vmatprep.mubr.msk.f32.mxu0 %vm4827_vm1, %v4826_v10 }
0x25b6   :  { %4526 = vmatpush3.bf16.msra.mxu0 %v5238_v16 }
0x25b7   :  { %4527 = vmatprep.subr.bf16.mxu0 %v4828_v49 }
0x2683   :  { %v3225_v53 = vpop.f32.mrb[20].mxu1  ;;  %v3371_v60 = vpop.f32.mrb[22].mxu0 }
0x2684   :  { %v3226_v41 = vadd.f32 %v5615_v59, %v3225_v53  ;;  %v3372_v42 = vadd.f32 %v5496_v23, %v3371_v60  ;;  %v4332_v43 = vpop.f32.mrb[21].mxu1  ;;  %v4350_v36 = vpop.f32.mrb[23].mxu0 }
0x2686   :  { %4650 = vtanh.f32 %v3226_v41  ;;  %v3382_v12 = vrot.slane %v3372_v42, %v5076_v8 }
0x2688   :  { %v3383_v46 = vcombine.high %v3382_v12, %v3382_v12  ;;  %v3390_v62 = vrot.slane %v3382_v12, %v5076_v8 }
0x268a   :  { %v3397_v15 = vrot.slane %v3383_v46, %v5076_v8  ;;  %v3401_v16 = vrot.slane %v3390_v62, %v5084_v17 }
0x268c   :  { %v3409_v51 = vadd.f32 %v3401_v16, %v5087_v21  ;;  %v3408_v54 = vadd.f32 %v3401_v16, %v5089_v22  ;;  %v3405_v31 = vrot.slane %v3397_v15, %v5084_v17 }
0x268e   :  { %v3413_v30 = vmax.f32 %v3409_v51, 0.0  ;;  %v3412_v23 = vmax.f32 %v3408_v54, 0.0  ;;  %v3410_v37 = vadd.f32 %v3405_v31, %v5095_v26  ;;  %v3411_v58 = vadd.f32 %v3405_v31, %v5093_v25 }
0x2690   :  { %v4651_v61 = vpop.eup %4650  ;;  %v3417_v63 = vmul.f32 %v5511_v4, %v3413_v30  ;;  %v3416_v2 = vmul.f32 %v5511_v4, %v3412_v23  ;;  %v3414_v8 = vmax.f32 %v3410_v37, 0.0  ;;  %v3415_v0 = vmax.f32 %v3411_v58, 0.0 }
0x2691   :  { %4338 = vmatmul.mubr.msk.f32.vlgmr.msra.gmra.mrb[22].mxu1 %vm145_vm0, %v4651_v61 }
0x2692   :  { %v3423_v21 = vsel %vm175_vm3, %v3417_v63, 0.0  ;;  %v3420_v22 = vsel %vm175_vm3, %v3416_v2, 0.0  ;;  %v3418_v3 = vmul.f32 %v5511_v4, %v3414_v8  ;;  %4514 = vmatpush3.bf16.msra.mxu1 %v5154_v1  ;;  %4365 = vmatprep.mubr.msk.f32.mxu1 %vm4827_vm1, %v4826_v10  ;;  %v3419_v26 = vmul.f32 %v5511_v4, %v3415_v0 }
0x2693   :  { %3424 = vadd.xlane.f32.xlu1 %v3423_v21  ;;  %3421 = vadd.xlane.f32.xlu0 %v3420_v22 }
0x2694   :  { %4515 = vmatprep.subr.bf16.mxu1 %v4828_v49  ;;  %v3426_v25 = vsel %vm175_vm3, %v3418_v3, 0.0  ;;  %v3429_v56 = vsel %vm175_vm3, %v3419_v26, 0.0 }
0x2696   :  { %4517 = vmatpush3.bf16.msra.mxu1 %v5176_v32 }
0x2697   :  { %3427 = vadd.xlane.f32.xlu0 %v3426_v25  ;;  %4518 = vmatprep.subr.bf16.mxu1 %v4828_v49 }
0x269a   :  { %4520 = vmatpush3.bf16.msra.mxu1 %v5186_v35 }
0x269b   :  { %3430 = vadd.xlane.f32.xlu0 %v3429_v56  ;;  %4363 = vmatprep.subr.mxu1 %v4826_v10 }
0x269e   :  { %4364 = vmatpush3.msra.mxu1 %v5648_v47 }
0x2720   :  { %v3422_v1 = vpop.xlane.xlu0 %3421  ;;  %v3425_v5 = vpop.xlane.xlu1 %3424 }
0x2721   :  { %v3433_v48 = vadd.f32 %v3425_v5, %v5119_v57  ;;  %v3432_v4 = vadd.f32 %v3422_v1, %v5119_v57 }
0x2723   :  { %v3447_v49 = vrot.slane %v3433_v48, %v5117_v55  ;;  %v3443_v50 = vrot.slane %v3432_v4, %v5022_v18 }
0x2724   :  { %v3428_v6 = vpop.xlane.xlu0 %3427 }
0x2725   :  { %v3434_v32 = vadd.f32 %v3428_v6, %v5119_v57  ;;  %v3448_v20 = vsel %vm631_vm5, %v3447_v49, %v3443_v50 }
0x2727   :  { %v3452_v13 = vrot.slane %v3434_v32, %v5022_v18 }
0x2728   :  { %v3431_v11 = vpop.xlane.xlu0 %3430 }
0x2729   :  { %v3435_v35 = vadd.f32 %v3431_v11, %v5119_v57 }
0x272b   :  { %v3456_v47 = vrot.slane %v3435_v35, %v5117_v55 }
0x272d   :  { %v3457_v24 = vsel %vm631_vm5, %v3456_v47, %v3452_v13 }
0x272e   :  { %v3458_v27 = vsel %vm173_vm2, %v3457_v24, %v3448_v20 }
0x272f   :  { %v3460_v52 = vsel %vm644_vm6, %v3458_v27, -inf }
0x2730   :  { %3461 = vmax.xlane.f32.xlu1 %v3460_v52 }
0x2764   :  { %v3299_v28 = vpop.f32.mrb[22].mxu1 }
0x2765   :  { %v3300_v34 = vadd.f32 %v5667_v19, %v3299_v28  ;;  %v4339_v14 = vpop.f32.mrb[23].mxu1 }
0x2766   :  { %v3304_v14 = vld [vmem:[#allocation3 + $0xa] sm:$0x3] }
0x2767   :  { %3864 = vst [vmem:[#allocation11 + $0x8] sm:$0x3] %v3300_v34 }
0x27bd   :  { %v3462_v40 = vpop.xlane.xlu1 %3461 }
0x27be   :  { %v3467_v57 = vrot.slane %v3462_v40, %v5084_v17  ;;  %v3471_v53 = vrot.slane %v3462_v40, %v5134_v9 }
0x27c0   :  { %v3474_v60 = vsub.f32 %v3432_v4, %v3467_v57  ;;  %v3475_v41 = vsub.f32 %v3433_v48, %v3467_v57  ;;  %v3477_v42 = vsub.f32 %v3435_v35, %v3471_v53  ;;  %v3476_v43 = vsub.f32 %v3434_v32, %v3471_v53 }
0x27c2   :  { %v3478_v36 = vmul.f32 1.442695, %v3474_v60  ;;  %v3480_v12 = vmul.f32 1.442695, %v3475_v41  ;;  %v3484_v46 = vmul.f32 1.442695, %v3477_v42 }
0x27c3   :  { %v3482_v62 = vmul.f32 1.442695, %v3476_v43 }
0x27c4   :  { %4652 = vpow2.f32 %v3478_v36 }
0x27c5   :  { %4654 = vpow2.f32 %v3480_v12 }
0x27c6   :  { %4656 = vpow2.f32 %v3484_v46 }
0x27c7   :  { %4658 = vpow2.f32 %v3482_v62 }
0x27ce   :  { %v4653_v15 = vpop.eup %4652 }
0x27cf   :  { %v4655_v16 = vpop.eup %4654  ;;  %3491 = vperm.xlu0 %4546, %v4653_v15  }
0x27d0   :  { %3494 = vperm.xlu1 %4547, %v4655_v16   ;;  %v4657_v51 = vpop.eup %4656 }
0x27d1   :  { %v4659_v54 = vpop.eup %4658 }
0x27d3   :  { %3500 = vperm.xlu0 %4546, %v4657_v51  }
0x27d4   :  { %3497 = vperm.xlu1 %4547, %v4659_v54  }
0x284e   :  { %v3492_v31 = vpop.permute.xlu0 %3491 }
0x284f   :  { %v3495_v30 = vpop.permute.xlu1 %3494  ;;  %v3505_v37 = vrot.slane %v3492_v31, %v5022_v18 }
0x2850   :  { %v3509_v23 = vrot.slane %v3495_v30, %v5117_v55 }
0x2852   :  { %v3501_v58 = vpop.permute.xlu0 %3500  ;;  %v3510_v8 = vsel %vm631_vm5, %v3509_v23, %v3505_v37 }
0x2853   :  { %v3498_v61 = vpop.permute.xlu1 %3497  ;;  %v3518_v63 = vrot.slane %v3501_v58, %v5117_v55 }
0x2854   :  { %v3514_v2 = vrot.slane %v3498_v61, %v5022_v18 }
0x2856   :  { %v3519_v21 = vsel %vm631_vm5, %v3518_v63, %v3514_v2 }
0x2857   :  { %v3520_v22 = vsel %vm173_vm2, %v3519_v21, %v3510_v8 }
0x2858   :  { %v3522_v3 = vsel %vm644_vm6, %v3520_v22, 0.0 }
0x2859   :  { %3523 = vadd.xlane.f32.xlu1 %v3522_v3 }
0x28e6   :  { %v3524_v0 = vpop.xlane.xlu1 %3523 }
0x28e7   :  { %4660 = vrcp.f32 %v3524_v0 }
0x28f1   :  { %v4661_v25 = vpop.eup %4660 }
0x28f2   :  { %v3530_v26 = vrot.slane %v4661_v25, %v5084_v17  ;;  %v3534_v5 = vrot.slane %v4661_v25, %v5134_v9 }
0x28f4   :  { %v3537_v56 = vmul.f32 %v4653_v15, %v3530_v26  ;;  %v3538_v1 = vmul.f32 %v4655_v16, %v3530_v26  ;;  %v3539_v6 = vmul.f32 %v4659_v54, %v3534_v5  ;;  %v3540_v48 = vmul.f32 %v4657_v51, %v3534_v5 }
0x28f6   :  { %3546 = vperm.xlu0 %4546, %v3537_v56  }
0x28fa   :  { %3549 = vperm.xlu0 %4546, %v3538_v1  }
0x28fe   :  { %3552 = vperm.xlu0 %4546, %v3539_v6  }
0x2902   :  { %3555 = vperm.xlu0 %4546, %v3540_v48  }
0x2975   :  { %v3547_v4 = vpop.permute.xlu0 %3546 }
0x2976   :  { %v3560_v11 = vrot.slane %v3547_v4, %v5022_v18 }
0x2979   :  { %v3550_v32 = vpop.permute.xlu0 %3549 }
0x297a   :  { %v3564_v49 = vrot.slane %v3550_v32, %v5117_v55 }
0x297c   :  { %v3565_v50 = vsel %vm631_vm5, %v3564_v49, %v3560_v11 }
0x297d   :  { %v3553_v35 = vpop.permute.xlu0 %3552  ;;  %v3589_v17 = vmul.f32 %v3565_v50, %v5030_v44 }
0x297e   :  { %v3569_v47 = vrot.slane %v3553_v35, %v5022_v18 }
0x297f   :  { %v3591_v13 = vsel %vm145_vm0, %v3589_v17, 0.0 }
0x2980   :  { %3592 = vadd.xlane.f32.xlu0 %v3591_v13 }
0x2981   :  { %v3556_v9 = vpop.permute.xlu0 %3555 }
0x2982   :  { %v3573_v20 = vrot.slane %v3556_v9, %v5117_v55 }
0x2984   :  { %v3574_v24 = vsel %vm631_vm5, %v3573_v20, %v3569_v47 }
0x2985   :  { %v3590_v27 = vmul.f32 %v3574_v24, %v5032_v45  ;;  %v3871_v52 = vsel %vm173_vm2, %v3574_v24, %v3565_v50 }
0x2986   :  { %3883 = vst.msk [vmem:[#allocation12 + $0xa] sm:$0x3] %vm644_vm6, %v3871_v52 }
0x2987   :  { %v3594_v28 = vsel %vm145_vm0, %v3590_v27, 0.0 }
0x2988   :  { %3595 = vadd.xlane.f32.xlu1 %v3594_v28 }
0x2999   :  { %3609 = vrot.lane.b32.xlu1 %v5716_v7, %s4833_s8 }
0x2a0d   :  { %v3593_v44 = vpop.xlane.xlu0 %3592 }
0x2a0e   :  { %v3602_v18 = vrot.slane %v3593_v44, %v5202_v38 }
0x2a15   :  { %v3596_v34 = vpop.xlane.xlu1 %3595 }
0x2a16   :  { %v3606_v55 = vrot.slane %v3596_v34, %v5202_v38 }
0x2a18   :  { %v3607_v40 = vsel %vm173_vm2, %v3606_v55, %v3602_v18 }
0x2a19   :  { %v3610_v45 = vpop.permute.xlu1 %3609  ;;  %v3612_v57 = vsel %vm145_vm0, %v3304_v14, %v3607_v40 }
0x2a1a   :  { %v3613_v53 = vsel %vm805_vm7, %v3612_v57, %v3610_v45 }
0x2a1b   :  { %4366 = vmatmul.mubr.msk.f32.vlgmr.msra.gmra.mrb[24].mxu1 %vm813_vm8, %v3613_v53 }
0x2aee   :  { %v3683_v60 = vpop.f32.mrb[24].mxu1 }
0x2aef   :  { %v3684_v41 = vadd.f32 %v5586_v39, %v3683_v60  ;;  %v4367_v7 = vpop.f32.mrb[25].mxu1 }
0x2af1   :  { %4662 = vtanh.f32 %v3684_v41  ;;  %v3961_v43 = vmul.f32 -1.442695, %v3684_v41 }
0x2af3   :  { %4664 = vpow2.f32 %v3961_v43 }
0x2afb   :  { %v4663_v42 = vpop.eup %4662 }
0x2afc   :  { %3696 = vrot.lane.b32.xlu0 %v4663_v42, %s4832_s7 }
0x2afd   :  { %v4665_v38 = vpop.eup %4664 }
0x2afe   :  { %v3690_v36 = vadd.f32 1.0, %v4665_v38 }
0x2b00   :  { %4666 = vrcp.f32 %v3690_v36 }
0x2b0a   :  { %v4667_v12 = vpop.eup %4666 }
0x2b0b   :  { %v3694_v15 = vmul.f32 %v4667_v12, %v5712_v33 }
0x2b6e   :  { %v3697_v46 = vpop.permute.xlu0 %3696 }
0x2b6f   :  { %v3699_v62 = vmul.f32 %v4667_v12, %v3697_v46 }
0x2b71   :  { %3701 = vrot.lane.b32.xlu1 %v3699_v62, %s4822_s4 }
0x2be3   :  { %v3702_v16 = vpop.permute.xlu1 %3701 }
0x2be4   :  { %v3704_v51 = vadd.f32 %v3702_v16, %v3694_v15 }
0x2be6   :  { %4668 = vtanh.f32 %v3704_v51 }
0x2bf0   :  { %v4669_v39 = vpop.eup %4668 }
0x2bf1   :  { %3707 = vrot.lane.b32.xlu1 %v4669_v39, %s4832_s7  ;;  %s3901_s7 = sshll.u32 %s4834_s17, 4  ;;  %s3902_s7 = int_to_ptr.vmem [resolvable:$true] %s3901_s7 }
0x2bf2   :  { %s4766_s30 = scalar_lea.vmem %s3902_s7, 192  ;;  %p4771_p5 = scmp.lt.s32.totalorder %s3902_s7, %s3902_s7 }
0x2bf3   :  { %p4767_p4 = scmp.ne.s32.totalorder %s3902_s7, %s4766_s30  ;;  %p4772_p6 = scmp.lt.s32.totalorder %s4766_s30, %s4766_s30 }
0x2bf5   :  { %p4773_p7 = por %p4772_p6, %p4771_p5 }
0x2bf7   :  { %p4774_p8 = pnand %p4773_p7, %p4767_p4 }
0x2c63   :  { %v3708_v54 = vpop.permute.xlu1 %3707 }
0x2c64   :  { %v3710_v31 = vmul.f32 %v4667_v12, %v3708_v54 }
0x2c66   :  { %3712 = vrot.lane.b32.xlu1 %v3710_v31, %s4822_s4 }
0x2cd8   :  { %v3713_v30 = vpop.permute.xlu1 %3712 }
0x2cd9   :  { %4377 = vmatmul.mubr.msk.f32.vlgmr.msra.gmra.mrb[24].mxu0 %vm468_vm4, %v3713_v30 }
0x2cda   :  { %4529 = vmatpush3.bf16.msra.mxu0 %v5268_v29  ;;  %4383 = vmatprep.mubr.msk.f32.mxu0 %vm4827_vm1, %v4826_v10 }
0x2dac   :  { %v3782_v23 = vpop.f32.mrb[24].mxu0 }
0x2dad   :  { %v3783_v33 = vadd.f32 %v5615_v59, %v3782_v23  ;;  %v4378_v37 = vpop.f32.mrb[25].mxu0 }
0x2daf   :  { %4670 = vtanh.f32 %v3783_v33 }
0x2db9   :  { %v4671_v58 = vpop.eup %4670 }
0x2dba   :  { %4384 = vmatmul.mubr.msk.f32.vlgmr.msra.gmra.mrb[26].mxu0 %vm145_vm0, %v4671_v58 }
0x2dbb   :  { %4777 = shalt.err (!%p4774_p8)
}
0x2dbc   :  { %s4778_s23 = scalar_lea.hbm %s5868_s19, 192 }
0x2dbd   :  { %p4779_p9 = scmp.ne.s32.totalorder %s5868_s19, %s4778_s23  ;;  %p4782_p10 = scmp.lt.u32.totalorder %s4778_s23, %s5868_s19 }
0x2dbf   :  { %p4784_p11 = pnand %p4782_p10, %p4779_p9 }
0x2dc1   :  { %4787 = shalt.err (!%p4784_p11)
}
0x2dc2   :  { %3907 = dma.vmem_to_hbm [thread:$0]  %s3902_s7, 192, %s5868_s19, [#allocation13], %s4822_s4, %s4822_s4, %s4823_s21  }
0x2dc3   :  { %s4835_s16 = smov [#allocation11]  }
0x2dc4   :  { %s3889_s22 = sshll.u32 %s4835_s16, 4  ;;  %s3890_s22 = int_to_ptr.vmem [resolvable:$true] %s3889_s22 }
0x2dc5   :  { %s4788_s8 = scalar_lea.vmem %s3890_s22, 192  ;;  %p4793_p13 = scmp.lt.s32.totalorder %s3890_s22, %s3890_s22 }
0x2dc6   :  { %p4789_p12 = scmp.ne.s32.totalorder %s3890_s22, %s4788_s8  ;;  %p4794_p0 = scmp.lt.s32.totalorder %s4788_s8, %s4788_s8 }
0x2dc8   :  { %p4795_p1 = por %p4794_p0, %p4793_p13 }
0x2dca   :  { %p4796_p2 = pnand %p4795_p1, %p4789_p12 }
0x2e8d   :  { %v3856_v10 = vpop.f32.mrb[26].mxu0 }
0x2e8e   :  { %v3857_v29 = vadd.f32 %v5667_v19, %v3856_v10  ;;  %v4385_v59 = vpop.f32.mrb[27].mxu0 }
0x2e90   :  { %3865 = vst [vmem:[#allocation11 + $0xa] sm:$0x3] %v3857_v29 }
0x2e91   :  { %4799 = shalt.err (!%p4796_p2)
}
0x2e92   :  { %s4800_s9 = scalar_lea.hbm %s5867_s18, 192 }
0x2e93   :  { %p4801_p3 = scmp.ne.s32.totalorder %s5867_s18, %s4800_s9  ;;  %p4804_p4 = scmp.lt.u32.totalorder %s4800_s9, %s5867_s18 }
0x2e95   :  { %p4806_p5 = pnand %p4804_p4, %p4801_p3 }
0x2e97   :  { %4809 = shalt.err (!%p4806_p5)
}
0x2e98   :  { %3895 = dma.vmem_to_hbm [thread:$0]  %s3890_s22, 192, %s5867_s18, [#allocation5], %s4822_s4, %s4822_s4, %s4823_s21  }
0x2e99   :  { %4816 = dma.done.wait [#allocation5], 192  }
0x2e9a   :  { %4817 = vsyncadd [#allocation5], 4294967104 }
0x2e9b   :  { %4818 = dma.done.wait [#allocation13], 192  }
0x2e9c   :  { %4819 = vsyncadd [#allocation13], 4294967104 }
0x2e9d   :  { %3914 = vsyncpa [#allocation4], 1 }
0x2e9e   :  { %3915 = vsyncpa [#allocation7], 1 }
0x2e9f   :  { %3916 = vsyncpa [#allocation10], 1 }
0x2ea0   :  { %3917 = vsyncpa [#allocation5], 1 }
0x2ea1   :  { %3918 = vsyncpa [#allocation13], 1 }

</bundles_post_ra>
